<compile_context>
chip_gen: v7x
topology: tpu7x:2x2x1
jax: 0.10.0
libtpu: 0.0.40
codegen_flags: <defaults>
</compile_context>

<pallas_src>
import jax
import jax.numpy as jnp
from jax.experimental import pallas as pl
from jax.experimental.pallas import tpu as pltpu

INPUT_SIZE = 28 * 28          # 784
HIDDEN_SIZE = 256
NUM_CLASSES = 2


def ae_kernel(x_ref,
              w1_ref, b1_ref,   # encoder Linear(784 -> 256)
              w2_ref, b2_ref,   # encoder Linear(256 -> 2)
              w3_ref, b3_ref,   # decoder Linear(2 -> 256)
              w4_ref, b4_ref,   # decoder Linear(256 -> 784)
              xr_ref, h_ref):
    # In-kernel cast (no-op for f32 weights); keeps the wrapper free of any
    # extra HBM pass over x.
    x = x_ref[...].astype(w1_ref.dtype)

    # ---------------- encoder ----------------
    # Linear(784 -> 256) + ReLU  (MXU, f32 accumulation)
    z1 = jnp.dot(x, w1_ref[...], preferred_element_type=jnp.float32) + b1_ref[...]
    z1 = jnp.maximum(z1, 0.0)

    # Linear(256 -> 2): tiny N=2 output, single small MXU push (kept in f32).
    h = jnp.dot(z1, w2_ref[...], preferred_element_type=jnp.float32) + b2_ref[...]
    h_ref[...] = h.astype(h_ref.dtype)

    # ---------------- decoder ----------------
    # Linear(2 -> 256) + ReLU: K=2 contraction on the VPU (two broadcast
    # multiply-adds) instead of a nearly-idle MXU tile.
    w3 = w3_ref[...]
    z2 = h[:, 0:1] * w3[0:1, :] + h[:, 1:2] * w3[1:2, :] + b3_ref[...]
    z2 = jnp.maximum(z2, 0.0)

    # Linear(256 -> 784) + Tanh  (MXU, f32 accumulation; EUP tanh; direct
    # 784-wide store — only the last vreg group is lane-masked).
    xr = jnp.dot(z2.astype(w4_ref.dtype), w4_ref[...],
                 preferred_element_type=jnp.float32) + b4_ref[...]
    xr_ref[...] = jnp.tanh(xr).astype(xr_ref.dtype)


def prepare_params(params, weights_dtype=jnp.float32):
    """One-time (out-of-forward) weight prep: optional bf16 cast of the two
    big matrices.  Biases and the tiny 256<->2 layers stay f32."""
    p = dict(params)
    p["w1"] = params["w1"].astype(weights_dtype)
    p["w4"] = params["w4"].astype(weights_dtype)
    return p


def _batch_tile(B, block_b):
    """Batch tile: multiple of 8 (or == B), and >=2 grid steps when B >= 16
    so the parallel batch axis can shard across v7x's two TensorCores."""
    if B >= 2 * block_b:
        return block_b
    if B >= 16:
        half = (B + 1) // 2
        return min(block_b, ((half + 7) // 8) * 8)
    return B


def ae_forward(x, params, *, block_b=512, out_dtype=jnp.float32):
    """x: (B, 784) float32.  Returns (xr, h) matching the PyTorch module.

    `params` should come from `prepare_params` (w1/w4 may be bf16 for
    full-rate MXU and half the weight HBM bytes; f32 default is bit-faithful
    to the PyTorch module).  `out_dtype=jnp.bfloat16` halves xr's HBM stream.
    No padding, casting, or slicing happens in this wrapper — the kernel's
    DMA streams are the only HBM traffic per call.
    """
    B, D = x.shape
    assert D == INPUT_SIZE
    w1, b1 = params["w1"], params["b1"]
    w2, b2 = params["w2"], params["b2"]
    w3, b3 = params["w3"], params["b3"]
    w4, b4 = params["w4"], params["b4"]

    tb = _batch_tile(B, block_b)
    grid = (pl.cdiv(B, tb),)

    row = lambda i: (i, 0)      # batch-tiled blocks (pipelined / double-buffered)
    const = lambda i: (0, 0)    # weight/bias blocks stay resident in VMEM

    in_arrays = (x, w1, b1, w2, b2, w3, b3, w4, b4)
    in_specs = [
        pl.BlockSpec((tb, INPUT_SIZE), row),
        pl.BlockSpec((INPUT_SIZE, HIDDEN_SIZE), const),
        pl.BlockSpec((1, HIDDEN_SIZE), const),
        pl.BlockSpec((HIDDEN_SIZE, NUM_CLASSES), const),
        pl.BlockSpec((1, NUM_CLASSES), const),
        pl.BlockSpec((NUM_CLASSES, HIDDEN_SIZE), const),
        pl.BlockSpec((1, HIDDEN_SIZE), const),
        pl.BlockSpec((HIDDEN_SIZE, INPUT_SIZE), const),
        pl.BlockSpec((1, INPUT_SIZE), const),
    ]
    out_shape = (
        jax.ShapeDtypeStruct((B, INPUT_SIZE), out_dtype),       # xr
        jax.ShapeDtypeStruct((B, NUM_CLASSES), jnp.float32),    # h
    )
    out_specs = (
        pl.BlockSpec((tb, INPUT_SIZE), row),
        pl.BlockSpec((tb, NUM_CLASSES), row),
    )

    # Advisory cost estimate (big matmuls + tanh dominate).
    flops = 2 * B * (INPUT_SIZE * HIDDEN_SIZE + HIDDEN_SIZE * NUM_CLASSES
                     + NUM_CLASSES * HIDDEN_SIZE + HIDDEN_SIZE * INPUT_SIZE)
    bytes_accessed = (
        sum(int(a.size) * a.dtype.itemsize for a in in_arrays)
        + B * INPUT_SIZE * jnp.dtype(out_dtype).itemsize
        + B * NUM_CLASSES * 4)

    xr, h = pl.pallas_call(
        ae_kernel,
        out_shape=out_shape,
        grid=grid,
        in_specs=in_specs,
        out_specs=out_specs,
        compiler_params=pltpu.CompilerParams(
            dimension_semantics=("parallel",),
            # Raises v5e's 16 MiB scoped default; matches v6e/v7x defaults and
            # is far below every generation's physical VMEM.
            vmem_limit_bytes=32 * 1024 * 1024),
        cost_estimate=pl.CostEstimate(
            flops=flops,
            transcendentals=B * INPUT_SIZE,
            bytes_accessed=bytes_accessed),
    )(*in_arrays)

    return xr, h


def init_params(key):
    """Deterministic parameter init (shapes match the PyTorch module)."""
    ks = jax.random.split(key, 8)

    def linear(kw, kb, fan_in, fan_out):
        bound = 1.0 / jnp.sqrt(fan_in)
        w = jax.random.uniform(kw, (fan_in, fan_out), jnp.float32, -bound, bound)
        b = jax.random.uniform(kb, (1, fan_out), jnp.float32, -bound, bound)
        return w, b

    w1, b1 = linear(ks[0], ks[1], INPUT_SIZE, HIDDEN_SIZE)
    w2, b2 = linear(ks[2], ks[3], HIDDEN_SIZE, NUM_CLASSES)
    w3, b3 = linear(ks[4], ks[5], NUM_CLASSES, HIDDEN_SIZE)
    w4, b4 = linear(ks[6], ks[7], HIDDEN_SIZE, INPUT_SIZE)
    return dict(w1=w1, b1=b1, w2=w2, b2=b2, w3=w3, b3=b3, w4=w4, b4=b4)


def ae_forward_ref(x, p):
    """Pure-JAX reference for correctness checking."""
    z1 = jnp.maximum(x @ p["w1"] + p["b1"], 0.0)
    h = z1 @ p["w2"] + p["b2"]
    z2 = jnp.maximum(h @ p["w3"] + p["b3"], 0.0)
    xr = jnp.tanh(z2 @ p["w4"] + p["b4"])
    return xr, h


if __name__ == "__main__":
    key = jax.random.PRNGKey(0)
    k_param, k_x = jax.random.split(key)

    B = 8
    params = init_params(k_param)
    x = jax.random.uniform(k_x, (B, INPUT_SIZE), jnp.float32, -1.0, 1.0)

    fwd = jax.jit(ae_forward, static_argnames=("block_b", "out_dtype"))
    xr_ref, h_ref = ae_forward_ref(x, params)

    # f32 path — exact semantics of the PyTorch module.
    p_f32 = prepare_params(params)                    # no-op cast, done once
    xr, h = fwd(x, p_f32)
    jax.block_until_ready((xr, h))
    assert xr.shape == (B, INPUT_SIZE) and h.shape == (B, NUM_CLASSES)
    assert jnp.allclose(xr, xr_ref, atol=1e-5, rtol=1e-5)
    assert jnp.allclose(h, h_ref, atol=1e-5, rtol=1e-5)

    # bf16 fast path: bf16 weights for the big matmuls (hoisted, one-time cast)
    # + bf16 xr output — looser tolerance.
    p_bf16 = prepare_params(params, jnp.bfloat16)
    xr16, h16 = fwd(x, p_bf16, out_dtype=jnp.bfloat16)
    jax.block_until_ready((xr16, h16))
    assert xr16.dtype == jnp.bfloat16
    assert jnp.allclose(xr16.astype(jnp.float32), xr_ref, atol=5e-2, rtol=5e-2)
    assert jnp.allclose(h16, h_ref, atol=5e-2, rtol=5e-2)

    print("KERNEL_OK")
</pallas_src>

<mosaic_0001>
module attributes {stable_mosaic.version = 11 : i64} {
  func.func @ae_kernel(%arg0: i32, %arg1: memref<8x784xf32, #tpu.memory_space<vmem>>, %arg2: memref<784x256xf32, #tpu.memory_space<vmem>>, %arg3: memref<1x256xf32, #tpu.memory_space<vmem>>, %arg4: memref<256x2xf32, #tpu.memory_space<vmem>>, %arg5: memref<1x2xf32, #tpu.memory_space<vmem>>, %arg6: memref<2x256xf32, #tpu.memory_space<vmem>>, %arg7: memref<1x256xf32, #tpu.memory_space<vmem>>, %arg8: memref<256x784xf32, #tpu.memory_space<vmem>>, %arg9: memref<1x784xf32, #tpu.memory_space<vmem>>, %arg10: memref<8x784xf32, #tpu.memory_space<vmem>>, %arg11: memref<8x2xf32, #tpu.memory_space<vmem>>) attributes {dimension_semantics = [#tpu.dimension_semantics<parallel>], iteration_bounds = array<i64: 1>, scalar_prefetch = 0 : i64, scratch_operands = 0 : i64, tpu.core_type = #tpu.core_type<tc>, window_params = [{transform_indices = @transform_0, window_bounds = array<i64: 8, 784>}, {pipeline_mode = #tpu.pipeline_mode<synchronous>, transform_indices = @transform_1, window_bounds = array<i64: 784, 256>}, {pipeline_mode = #tpu.pipeline_mode<synchronous>, transform_indices = @transform_2, window_bounds = array<i64: 1, 256>}, {pipeline_mode = #tpu.pipeline_mode<synchronous>, transform_indices = @transform_3, window_bounds = array<i64: 256, 2>}, {pipeline_mode = #tpu.pipeline_mode<synchronous>, transform_indices = @transform_4, window_bounds = array<i64: 1, 2>}, {pipeline_mode = #tpu.pipeline_mode<synchronous>, transform_indices = @transform_5, window_bounds = array<i64: 2, 256>}, {pipeline_mode = #tpu.pipeline_mode<synchronous>, transform_indices = @transform_6, window_bounds = array<i64: 1, 256>}, {pipeline_mode = #tpu.pipeline_mode<synchronous>, transform_indices = @transform_7, window_bounds = array<i64: 256, 784>}, {pipeline_mode = #tpu.pipeline_mode<synchronous>, transform_indices = @transform_8, window_bounds = array<i64: 1, 784>}, {transform_indices = @transform_9, window_bounds = array<i64: 8, 784>}, {transform_indices = @transform_10, window_bounds = array<i64: 8, 2>}]} {
    %c0 = arith.constant 0 : index
    %c0_0 = arith.constant 0 : index
    %0 = vector.load %arg1[%c0, %c0_0] : memref<8x784xf32, #tpu.memory_space<vmem>>, vector<8x784xf32>
    %c0_1 = arith.constant 0 : index
    %c0_2 = arith.constant 0 : index
    %1 = vector.load %arg2[%c0_1, %c0_2] : memref<784x256xf32, #tpu.memory_space<vmem>>, vector<784x256xf32>
    %cst = arith.constant dense<0.000000e+00> : vector<8x256xf32>
    %2 = tpu.matmul %0, %1, %cst {dimension_numbers = #tpu.dot_dimension_numbers<[1], [0], [0], [1], [0, 0, 1, 1], [], []>} : vector<8x784xf32>, vector<784x256xf32>, vector<8x256xf32> -> vector<8x256xf32>
    %c0_3 = arith.constant 0 : index
    %c0_4 = arith.constant 0 : index
    %3 = vector.load %arg3[%c0_3, %c0_4] : memref<1x256xf32, #tpu.memory_space<vmem>>, vector<1x256xf32>
    %4 = vector.broadcast %3 : vector<1x256xf32> to vector<8x256xf32>
    %5 = arith.addf %2, %4 : vector<8x256xf32>
    %cst_5 = arith.constant 0.000000e+00 : f32
    %6 = vector.broadcast %cst_5 : f32 to vector<8x256xf32>
    %7 = arith.maximumf %5, %6 : vector<8x256xf32>
    %c0_6 = arith.constant 0 : index
    %c0_7 = arith.constant 0 : index
    %8 = vector.load %arg4[%c0_6, %c0_7] : memref<256x2xf32, #tpu.memory_space<vmem>>, vector<256x2xf32>
    %cst_8 = arith.constant dense<0.000000e+00> : vector<8x2xf32>
    %9 = tpu.matmul %7, %8, %cst_8 {dimension_numbers = #tpu.dot_dimension_numbers<[1], [0], [0], [1], [0, 0, 1, 1], [], []>} : vector<8x256xf32>, vector<256x2xf32>, vector<8x2xf32> -> vector<8x2xf32>
    %c0_9 = arith.constant 0 : index
    %c0_10 = arith.constant 0 : index
    %10 = vector.load %arg5[%c0_9, %c0_10] : memref<1x2xf32, #tpu.memory_space<vmem>>, vector<1x2xf32>
    %11 = vector.broadcast %10 : vector<1x2xf32> to vector<8x2xf32>
    %12 = arith.addf %9, %11 : vector<8x2xf32>
    %c0_11 = arith.constant 0 : index
    %c0_12 = arith.constant 0 : index
    %13 = vector.load %arg11[%c0_11, %c0_12] : memref<8x2xf32, #tpu.memory_space<vmem>>, vector<8x2xf32>
    tpu.vector_store %arg11[%c0_11, %c0_12], %12 {strides = array<i32>} : memref<8x2xf32, #tpu.memory_space<vmem>>, vector<8x2xf32>,
    %c0_13 = arith.constant 0 : index
    %c0_14 = arith.constant 0 : index
    %14 = vector.load %arg6[%c0_13, %c0_14] : memref<2x256xf32, #tpu.memory_space<vmem>>, vector<2x256xf32>
    %15 = vector.extract_strided_slice %12 {offsets = [0, 0], sizes = [8, 1], strides = [1, 1]} : vector<8x2xf32> to vector<8x1xf32>
    %16 = vector.extract_strided_slice %14 {offsets = [0, 0], sizes = [1, 256], strides = [1, 1]} : vector<2x256xf32> to vector<1x256xf32>
    %17 = vector.broadcast %15 : vector<8x1xf32> to vector<8x256xf32>
    %18 = vector.broadcast %16 : vector<1x256xf32> to vector<8x256xf32>
    %19 = arith.mulf %17, %18 : vector<8x256xf32>
    %20 = vector.extract_strided_slice %12 {offsets = [0, 1], sizes = [8, 1], strides = [1, 1]} : vector<8x2xf32> to vector<8x1xf32>
    %21 = vector.extract_strided_slice %14 {offsets = [1, 0], sizes = [1, 256], strides = [1, 1]} : vector<2x256xf32> to vector<1x256xf32>
    %22 = vector.broadcast %20 : vector<8x1xf32> to vector<8x256xf32>
    %23 = vector.broadcast %21 : vector<1x256xf32> to vector<8x256xf32>
    %24 = arith.mulf %22, %23 : vector<8x256xf32>
    %25 = arith.addf %19, %24 : vector<8x256xf32>
    %c0_15 = arith.constant 0 : index
    %c0_16 = arith.constant 0 : index
    %26 = vector.load %arg7[%c0_15, %c0_16] : memref<1x256xf32, #tpu.memory_space<vmem>>, vector<1x256xf32>
    %27 = vector.broadcast %26 : vector<1x256xf32> to vector<8x256xf32>
    %28 = arith.addf %25, %27 : vector<8x256xf32>
    %cst_17 = arith.constant 0.000000e+00 : f32
    %29 = vector.broadcast %cst_17 : f32 to vector<8x256xf32>
    %30 = arith.maximumf %28, %29 : vector<8x256xf32>
    %c0_18 = arith.constant 0 : index
    %c0_19 = arith.constant 0 : index
    %31 = vector.load %arg8[%c0_18, %c0_19] : memref<256x784xf32, #tpu.memory_space<vmem>>, vector<256x784xf32>
    %cst_20 = arith.constant dense<0.000000e+00> : vector<8x784xf32>
    %32 = tpu.matmul %30, %31, %cst_20 {dimension_numbers = #tpu.dot_dimension_numbers<[1], [0], [0], [1], [0, 0, 1, 1], [], []>} : vector<8x256xf32>, vector<256x784xf32>, vector<8x784xf32> -> vector<8x784xf32>
    %c0_21 = arith.constant 0 : index
    %c0_22 = arith.constant 0 : index
    %33 = vector.load %arg9[%c0_21, %c0_22] : memref<1x784xf32, #tpu.memory_space<vmem>>, vector<1x784xf32>
    %34 = vector.broadcast %33 : vector<1x784xf32> to vector<8x784xf32>
    %35 = arith.addf %32, %34 : vector<8x784xf32>
    %36 = math.tanh %35 : vector<8x784xf32>
    %c0_23 = arith.constant 0 : index
    %c0_24 = arith.constant 0 : index
    %37 = vector.load %arg10[%c0_23, %c0_24] : memref<8x784xf32, #tpu.memory_space<vmem>>, vector<8x784xf32>
    tpu.vector_store %arg10[%c0_23, %c0_24], %36 {strides = array<i32>} : memref<8x784xf32, #tpu.memory_space<vmem>>, vector<8x784xf32>,
    return
  }
  func.func @transform_0(%arg0: i32) -> (i32, i32) {
    %c0_i32 = arith.constant 0 : i32
    %c0_i32_0 = arith.constant 0 : i32
    return %arg0, %c0_i32 : i32, i32
  }
  func.func @transform_1(%arg0: i32) -> (i32, i32) {
    %c0_i32 = arith.constant 0 : i32
    %c0_i32_0 = arith.constant 0 : i32
    %c0_i32_1 = arith.constant 0 : i32
    return %c0_i32, %c0_i32_0 : i32, i32
  }
  func.func @transform_2(%arg0: i32) -> (i32, i32) {
    %c0_i32 = arith.constant 0 : i32
    %c0_i32_0 = arith.constant 0 : i32
    %c0_i32_1 = arith.constant 0 : i32
    return %c0_i32, %c0_i32_0 : i32, i32
  }
  func.func @transform_3(%arg0: i32) -> (i32, i32) {
    %c0_i32 = arith.constant 0 : i32
    %c0_i32_0 = arith.constant 0 : i32
    %c0_i32_1 = arith.constant 0 : i32
    return %c0_i32, %c0_i32_0 : i32, i32
  }
  func.func @transform_4(%arg0: i32) -> (i32, i32) {
    %c0_i32 = arith.constant 0 : i32
    %c0_i32_0 = arith.constant 0 : i32
    %c0_i32_1 = arith.constant 0 : i32
    return %c0_i32, %c0_i32_0 : i32, i32
  }
  func.func @transform_5(%arg0: i32) -> (i32, i32) {
    %c0_i32 = arith.constant 0 : i32
    %c0_i32_0 = arith.constant 0 : i32
    %c0_i32_1 = arith.constant 0 : i32
    return %c0_i32, %c0_i32_0 : i32, i32
  }
  func.func @transform_6(%arg0: i32) -> (i32, i32) {
    %c0_i32 = arith.constant 0 : i32
    %c0_i32_0 = arith.constant 0 : i32
    %c0_i32_1 = arith.constant 0 : i32
    return %c0_i32, %c0_i32_0 : i32, i32
  }
  func.func @transform_7(%arg0: i32) -> (i32, i32) {
    %c0_i32 = arith.constant 0 : i32
    %c0_i32_0 = arith.constant 0 : i32
    %c0_i32_1 = arith.constant 0 : i32
    return %c0_i32, %c0_i32_0 : i32, i32
  }
  func.func @transform_8(%arg0: i32) -> (i32, i32) {
    %c0_i32 = arith.constant 0 : i32
    %c0_i32_0 = arith.constant 0 : i32
    %c0_i32_1 = arith.constant 0 : i32
    return %c0_i32, %c0_i32_0 : i32, i32
  }
  func.func @transform_9(%arg0: i32) -> (i32, i32) {
    %c0_i32 = arith.constant 0 : i32
    %c0_i32_0 = arith.constant 0 : i32
    return %arg0, %c0_i32 : i32, i32
  }
  func.func @transform_10(%arg0: i32) -> (i32, i32) {
    %c0_i32 = arith.constant 0 : i32
    %c0_i32_0 = arith.constant 0 : i32
    return %arg0, %c0_i32 : i32, i32
  }
}

</mosaic_0001>

<bundles_post_ra>
// kernel: ae_forward.1
= control target key start
LH: loop header
LB: loop body
LE: loop exit
PB: predicated region body
PF: predicated region fallthrough
CT: control target
= control target key end

     0   :  { %s3385_s0 = inlined_call_operand.vmem [shape: f32[8,784], index: 0, kind: input, shape index: {}]   ;;  %s3386_s1 = inlined_call_operand.vmem [shape: f32[784,256], index: 1, kind: input, shape index: {}]   ;;  %s3387_s2 = inlined_call_operand.vmem [shape: f32[1,256], index: 2, kind: input, shape index: {}]   ;;  %s3388_s3 = inlined_call_operand.vmem [shape: f32[256,2], index: 3, kind: input, shape index: {}]   ;;  %s3389_s4 = inlined_call_operand.vmem [shape: f32[1,2], index: 4, kind: input, shape index: {}]   ;;  %s3390_s5 = inlined_call_operand.vmem [shape: f32[2,256], index: 5, kind: input, shape index: {}]   ;;  %s3391_s6 = inlined_call_operand.vmem [shape: f32[1,256], index: 6, kind: input, shape index: {}]   ;;  %s3392_s7 = inlined_call_operand.vmem [shape: f32[256,784], index: 7, kind: input, shape index: {}]   ;;  %s3393_s8 = inlined_call_operand.vmem [shape: f32[1,784], index: 8, kind: input, shape index: {}]   ;;  %s3394_s9 = inlined_call_operand.hbm [shape: f32[8,784], index: 9, kind: output, shape index: {0}]   ;;  %s3395_s10 = inlined_call_operand.vmem [shape: f32[8,2], index: 10, kind: output, shape index: {1}]  }
   0x1   :  { %v43_v0 = vld [vmem:[%s3386_s1 + $0x8] sm:$0xff]  ;;  %v45_v1 = vld [vmem:[%s3386_s1 + $0x18] sm:$0xff]  ;;  %v42_v2 = vld [vmem:[%s3386_s1] sm:$0xff] }
   0x2   :  { %v1368_v3 = vpack.c.bf16 %v45_v1, %v43_v0  ;;  %v44_v4 = vld [vmem:[%s3386_s1 + $0x10] sm:$0xff]  ;;  %v47_v5 = vld [vmem:[%s3386_s1 + $0x28] sm:$0xff]  ;;  %v49_v6 = vld [vmem:[%s3386_s1 + $0x38] sm:$0xff] }
   0x3   :  { %v1370_v7 = vpack.c.bf16 %v44_v4, %v42_v2  ;;  %v1372_v8 = vpack.c.bf16 %v49_v6, %v47_v5  ;;  %v46_v9 = vld [vmem:[%s3386_s1 + $0x20] sm:$0xff]  ;;  %v48_v10 = vld [vmem:[%s3386_s1 + $0x30] sm:$0xff]  ;;  %v51_v11 = vld [vmem:[%s3386_s1 + $0x48] sm:$0xff] }
   0x4   :  { %1369 = vmatprep.subr.bf16.mxu0 %v1368_v3  ;;  %v53_v12 = vld [vmem:[%s3386_s1 + $0x58] sm:$0xff]  ;;  %v1374_v13 = vpack.c.bf16 %v48_v10, %v46_v9  ;;  %v50_v15 = vld [vmem:[%s3386_s1 + $0x40] sm:$0xff]  ;;  %v52_v16 = vld [vmem:[%s3386_s1 + $0x50] sm:$0xff] }
   0x5   :  { %1371 = vmatpush1.bf16.msra.mxu0 %v1370_v7  ;;  %v1376_v14 = vpack.c.bf16 %v53_v12, %v51_v11  ;;  %v55_v17 = vld [vmem:[%s3386_s1 + $0x68] sm:$0xff]  ;;  %v57_v18 = vld [vmem:[%s3386_s1 + $0x78] sm:$0xff]  ;;  %v1378_v19 = vpack.c.bf16 %v52_v16, %v50_v15  ;;  %v54_v21 = vld [vmem:[%s3386_s1 + $0x60] sm:$0xff] }
   0x6   :  { %1373 = vmatprep.subr.bf16.mxu0 %v1372_v8  ;;  %v1380_v20 = vpack.c.bf16 %v57_v18, %v55_v17  ;;  %v56_v22 = vld [vmem:[%s3386_s1 + $0x70] sm:$0xff]  ;;  %v59_v23 = vld [vmem:[%s3386_s1 + $0x88] sm:$0xff]  ;;  %v61_v24 = vld [vmem:[%s3386_s1 + $0x98] sm:$0xff] }
   0x7   :  { %v1382_v25 = vpack.c.bf16 %v56_v22, %v54_v21  ;;  %v1384_v26 = vpack.c.bf16 %v61_v24, %v59_v23  ;;  %v58_v27 = vld [vmem:[%s3386_s1 + $0x80] sm:$0xff]  ;;  %v60_v28 = vld [vmem:[%s3386_s1 + $0x90] sm:$0xff]  ;;  %v63_v29 = vld [vmem:[%s3386_s1 + $0xa8] sm:$0xff] }
   0x8   :  { %v65_v30 = vld [vmem:[%s3386_s1 + $0xb8] sm:$0xff]  ;;  %v1386_v31 = vpack.c.bf16 %v60_v28, %v58_v27  ;;  %v62_v33 = vld [vmem:[%s3386_s1 + $0xa0] sm:$0xff]  ;;  %v64_v34 = vld [vmem:[%s3386_s1 + $0xb0] sm:$0xff] }
   0x9   :  { %1375 = vmatpush1.bf16.msra.mxu0 %v1374_v13  ;;  %v1388_v32 = vpack.c.bf16 %v65_v30, %v63_v29  ;;  %v67_v35 = vld [vmem:[%s3386_s1 + $0xc8] sm:$0xff]  ;;  %v69_v36 = vld [vmem:[%s3386_s1 + $0xd8] sm:$0xff]  ;;  %v1390_v37 = vpack.c.bf16 %v64_v34, %v62_v33  ;;  %v66_v39 = vld [vmem:[%s3386_s1 + $0xc0] sm:$0xff] }
   0xa   :  { %1377 = vmatprep.subr.bf16.mxu0 %v1376_v14  ;;  %v1392_v38 = vpack.c.bf16 %v69_v36, %v67_v35  ;;  %v68_v40 = vld [vmem:[%s3386_s1 + $0xd0] sm:$0xff]  ;;  %v36_v41 = vld [vmem:[%s3385_s0 + $0x8] sm:$0xff]  ;;  %v73_v43 = vld [vmem:[%s3386_s1 + $0xf8] sm:$0xff] }
   0xb   :  { %v71_v42 = vld [vmem:[%s3386_s1 + $0xe8] sm:$0xff]  ;;  %318 = vmatprep.mubr.f32.mxu0 %v36_v41  ;;  %v1394_v44 = vpack.c.bf16 %v68_v40, %v66_v39  ;;  %v70_v46 = vld [vmem:[%s3386_s1 + $0xe0] sm:$0xff]  ;;  %v72_v47 = vld [vmem:[%s3386_s1 + $0xf0] sm:$0xff] }
   0xc   :  { %v1396_v45 = vpack.c.bf16 %v73_v43, %v71_v42  ;;  %v75_v48 = vld [vmem:[%s3386_s1 + $0x108] sm:$0xff]  ;;  %v77_v49 = vld [vmem:[%s3386_s1 + $0x118] sm:$0xff]  ;;  %v1398_v50 = vpack.c.bf16 %v72_v47, %v70_v46  ;;  %v74_v52 = vld [vmem:[%s3386_s1 + $0x100] sm:$0xff] }
   0xd   :  { %1379 = vmatpush1.bf16.msra.mxu0 %v1378_v19  ;;  %v1400_v51 = vpack.c.bf16 %v77_v49, %v75_v48  ;;  %v76_v53 = vld [vmem:[%s3386_s1 + $0x110] sm:$0xff]  ;;  %v79_v54 = vld [vmem:[%s3386_s1 + $0x128] sm:$0xff]  ;;  %v81_v55 = vld [vmem:[%s3386_s1 + $0x138] sm:$0xff] }
   0xe   :  { %1381 = vmatprep.subr.bf16.mxu0 %v1380_v20  ;;  %v1402_v56 = vpack.c.bf16 %v76_v53, %v74_v52  ;;  %v1404_v57 = vpack.c.bf16 %v81_v55, %v79_v54  ;;  %v78_v58 = vld [vmem:[%s3386_s1 + $0x120] sm:$0xff]  ;;  %v80_v59 = vld [vmem:[%s3386_s1 + $0x130] sm:$0xff]  ;;  %v83_v60 = vld [vmem:[%s3386_s1 + $0x148] sm:$0xff] }
   0xf   :  { %v85_v61 = vld [vmem:[%s3386_s1 + $0x158] sm:$0xff]  ;;  %v1406_v62 = vpack.c.bf16 %v80_v59, %v78_v58  ;;  %v82_v0 = vld [vmem:[%s3386_s1 + $0x140] sm:$0xff]  ;;  %v84_v1 = vld [vmem:[%s3386_s1 + $0x150] sm:$0xff] }
  0x10   :  { %v1408_v63 = vpack.c.bf16 %v85_v61, %v83_v60  ;;  %v87_v2 = vld [vmem:[%s3386_s1 + $0x168] sm:$0xff]  ;;  %v89_v3 = vld [vmem:[%s3386_s1 + $0x178] sm:$0xff]  ;;  %v1410_v4 = vpack.c.bf16 %v84_v1, %v82_v0  ;;  %v86_v6 = vld [vmem:[%s3386_s1 + $0x160] sm:$0xff] }
  0x11   :  { %1383 = vmatpush1.bf16.msra.mxu0 %v1382_v25  ;;  %v1412_v5 = vpack.c.bf16 %v89_v3, %v87_v2  ;;  %v88_v7 = vld [vmem:[%s3386_s1 + $0x170] sm:$0xff]  ;;  %v91_v8 = vld [vmem:[%s3386_s1 + $0x188] sm:$0xff]  ;;  %v93_v9 = vld [vmem:[%s3386_s1 + $0x198] sm:$0xff] }
  0x12   :  { %1385 = vmatprep.subr.bf16.mxu0 %v1384_v26  ;;  %v1414_v10 = vpack.c.bf16 %v88_v7, %v86_v6  ;;  %v1416_v11 = vpack.c.bf16 %v93_v9, %v91_v8  ;;  %v90_v12 = vld [vmem:[%s3386_s1 + $0x180] sm:$0xff]  ;;  %v92_v13 = vld [vmem:[%s3386_s1 + $0x190] sm:$0xff]  ;;  %v95_v14 = vld [vmem:[%s3386_s1 + $0x1a8] sm:$0xff] }
  0x13   :  { %v97_v15 = vld [vmem:[%s3386_s1 + $0x1b8] sm:$0xff]  ;;  %v1418_v16 = vpack.c.bf16 %v92_v13, %v90_v12  ;;  %v94_v18 = vld [vmem:[%s3386_s1 + $0x1a0] sm:$0xff]  ;;  %v96_v19 = vld [vmem:[%s3386_s1 + $0x1b0] sm:$0xff] }
  0x14   :  { %v1420_v17 = vpack.c.bf16 %v97_v15, %v95_v14  ;;  %v99_v20 = vld [vmem:[%s3386_s1 + $0x1c8] sm:$0xff]  ;;  %v101_v21 = vld [vmem:[%s3386_s1 + $0x1d8] sm:$0xff]  ;;  %v1422_v22 = vpack.c.bf16 %v96_v19, %v94_v18  ;;  %v98_v24 = vld [vmem:[%s3386_s1 + $0x1c0] sm:$0xff] }
  0x15   :  { %1387 = vmatpush1.bf16.msra.mxu0 %v1386_v31  ;;  %v1424_v23 = vpack.c.bf16 %v101_v21, %v99_v20  ;;  %v100_v25 = vld [vmem:[%s3386_s1 + $0x1d0] sm:$0xff]  ;;  %v103_v26 = vld [vmem:[%s3386_s1 + $0x1e8] sm:$0xff]  ;;  %v105_v27 = vld [vmem:[%s3386_s1 + $0x1f8] sm:$0xff] }
  0x16   :  { %1389 = vmatprep.subr.bf16.mxu0 %v1388_v32  ;;  %v1426_v28 = vpack.c.bf16 %v100_v25, %v98_v24  ;;  %v1428_v29 = vpack.c.bf16 %v105_v27, %v103_v26  ;;  %v102_v30 = vld [vmem:[%s3386_s1 + $0x1e0] sm:$0xff]  ;;  %v104_v31 = vld [vmem:[%s3386_s1 + $0x1f0] sm:$0xff]  ;;  %v107_v32 = vld [vmem:[%s3386_s1 + $0x208] sm:$0xff] }
  0x17   :  { %v109_v33 = vld [vmem:[%s3386_s1 + $0x218] sm:$0xff]  ;;  %v1430_v34 = vpack.c.bf16 %v104_v31, %v102_v30  ;;  %v106_v36 = vld [vmem:[%s3386_s1 + $0x200] sm:$0xff]  ;;  %v115_v46 = vld [vmem:[%s3386_s1 + $0x248] sm:$0xff] }
  0x18   :  { %v1432_v35 = vpack.c.bf16 %v109_v33, %v107_v32  ;;  %v113_v39 = vld [vmem:[%s3386_s1 + $0x238] sm:$0xff]  ;;  %v35_v40 = vld [vmem:[%s3385_s0] sm:$0xff] }
  0x19   :  { %1391 = vmatpush1.bf16.msra.mxu0 %v1390_v37  ;;  %v108_v37 = vld [vmem:[%s3386_s1 + $0x210] sm:$0xff]  ;;  %v110_v43 = vld [vmem:[%s3386_s1 + $0x220] sm:$0xff]  ;;  %v117_v47 = vld [vmem:[%s3386_s1 + $0x258] sm:$0xff] }
  0x1a   :  { %1393 = vmatprep.subr.bf16.mxu0 %v1392_v38  ;;  %v111_v38 = vld [vmem:[%s3386_s1 + $0x228] sm:$0xff]  ;;  %v1434_v41 = vpack.c.bf16 %v108_v37, %v106_v36 }
  0x1b   :  { %v1436_v42 = vpack.c.bf16 %v113_v39, %v111_v38 }
  0x1d   :  { %1395 = vmatpush1.bf16.msra.mxu0 %v1394_v44  ;;  %v112_v44 = vld [vmem:[%s3386_s1 + $0x230] sm:$0xff] }
  0x1e   :  { %1397 = vmatprep.subr.bf16.mxu0 %v1396_v45  ;;  %v38_v45 = vld [vmem:[%s3385_s0 + $0x18] sm:$0xff] }
  0x21   :  { %1399 = vmatpush1.bf16.msra.mxu0 %v1398_v50 }
  0x22   :  { %1401 = vmatprep.subr.bf16.mxu0 %v1400_v51 }
  0x25   :  { %1403 = vmatpush1.bf16.msra.mxu0 %v1402_v56 }
  0x26   :  { %1405 = vmatprep.subr.bf16.mxu0 %v1404_v57 }
  0x29   :  { %1407 = vmatpush1.bf16.msra.mxu0 %v1406_v62 }
  0x2a   :  { %1409 = vmatprep.subr.bf16.mxu0 %v1408_v63 }
  0x2d   :  { %1411 = vmatpush1.bf16.msra.mxu0 %v1410_v4 }
  0x2e   :  { %1413 = vmatprep.subr.bf16.mxu0 %v1412_v5 }
  0x31   :  { %1415 = vmatpush1.bf16.msra.mxu0 %v1414_v10 }
  0x32   :  { %1417 = vmatprep.subr.bf16.mxu0 %v1416_v11 }
  0x35   :  { %1419 = vmatpush1.bf16.msra.mxu0 %v1418_v16 }
  0x36   :  { %1421 = vmatprep.subr.bf16.mxu0 %v1420_v17 }
  0x39   :  { %1423 = vmatpush1.bf16.msra.mxu0 %v1422_v22 }
  0x3a   :  { %1425 = vmatprep.subr.bf16.mxu0 %v1424_v23 }
  0x3d   :  { %1427 = vmatpush1.bf16.msra.mxu0 %v1426_v28 }
  0x3e   :  { %1429 = vmatprep.subr.bf16.mxu0 %v1428_v29 }
  0x41   :  { %1431 = vmatpush1.bf16.msra.mxu0 %v1430_v34 }
  0x42   :  { %1433 = vmatprep.subr.bf16.mxu0 %v1432_v35 }
  0x43   :  { %16 = vsyncpa [#allocation3], 0  ;;  %v1438_v48 = vpack.c.bf16 %v112_v44, %v110_v43  ;;  %v1440_v49 = vpack.c.bf16 %v117_v47, %v115_v46  ;;  %v114_v50 = vld [vmem:[%s3386_s1 + $0x240] sm:$0xff]  ;;  %v116_v51 = vld [vmem:[%s3386_s1 + $0x250] sm:$0xff]  ;;  %vm250_vm0 = vcmask 130048   ;;  %vm649_vm1 = vcmask 15360  }
  0x44   :  { %319 = vmatmul.mubr.f32.vlgmr.msra.gmra.mrb[0].mxu0 %v35_v40  ;;  %v119_v52 = vld [vmem:[%s3386_s1 + $0x268] sm:$0xff]  ;;  %v121_v53 = vld [vmem:[%s3386_s1 + $0x278] sm:$0xff]  ;;  %v1442_v54 = vpack.c.bf16 %v116_v51, %v114_v50  ;;  %v118_v56 = vld [vmem:[%s3386_s1 + $0x260] sm:$0xff] }
  0x45   :  { %1435 = vmatpush1.bf16.msra.mxu0 %v1434_v41  ;;  %389 = vmatprep.mubr.f32.mxu0 %v38_v45  ;;  %v1444_v55 = vpack.c.bf16 %v121_v53, %v119_v52  ;;  %v120_v57 = vld [vmem:[%s3386_s1 + $0x270] sm:$0xff]  ;;  %v123_v58 = vld [vmem:[%s3386_s1 + $0x288] sm:$0xff]  ;;  %v125_v59 = vld [vmem:[%s3386_s1 + $0x298] sm:$0xff] }
  0x46   :  { %1437 = vmatprep.subr.bf16.mxu0 %v1436_v42  ;;  %v122_v60 = vld [vmem:[%s3386_s1 + $0x280] sm:$0xff]  ;;  %v124_v61 = vld [vmem:[%s3386_s1 + $0x290] sm:$0xff]  ;;  %v557_v63 = vld [vmem:[%s3388_s3 + $0x88] sm:$0xff]  ;;  %v1446_v1 = vpack.c.bf16 %v120_v57, %v118_v56  ;;  %v1448_v6 = vpack.c.bf16 %v125_v59, %v123_v58 }
  0x47   :  { %v556_v62 = vld [vmem:[%s3388_s3 + $0x80] sm:$0xff]  ;;  %v541_v3 = vld [vmem:[%s3388_s3 + $0x8] sm:$0xff]  ;;  %v558_v4 = vld [vmem:[%s3388_s3 + $0x90] sm:$0xff]  ;;  %v1450_v16 = vpack.c.bf16 %v124_v61, %v122_v60 }
  0x48   :  { %v540_v0 = vld [vmem:[%s3388_s3] sm:$0xff]  ;;  %v1564_v2 = vpack.c.bf16 %v557_v63, %v556_v62  ;;  %v559_v5 = vld [vmem:[%s3388_s3 + $0x98] sm:$0xff]  ;;  %v542_v9 = vld [vmem:[%s3388_s3 + $0x10] sm:$0xff] }
  0x49   :  { %1439 = vmatpush1.bf16.msra.mxu0 %v1438_v48  ;;  %v1566_v7 = vpack.c.bf16 %v541_v3, %v540_v0  ;;  %v1568_v8 = vpack.c.bf16 %v559_v5, %v558_v4  ;;  %v543_v10 = vld [vmem:[%s3388_s3 + $0x18] sm:$0xff]  ;;  %v560_v11 = vld [vmem:[%s3388_s3 + $0xa0] sm:$0xff]  ;;  %v127_v12 = vld [vmem:[%s3386_s1 + $0x2a8] sm:$0xff] }
  0x4a   :  { %1441 = vmatprep.subr.bf16.mxu0 %v1440_v49  ;;  %v129_v13 = vld [vmem:[%s3386_s1 + $0x2b8] sm:$0xff]  ;;  %1565 = vmatprep.subr.bf16.mxu1 %v1564_v2  ;;  %v561_v14 = vld [vmem:[%s3388_s3 + $0xa8] sm:$0xff]  ;;  %v1570_v15 = vpack.c.bf16 %v543_v10, %v542_v9  ;;  %v126_v17 = vld [vmem:[%s3386_s1 + $0x2a0] sm:$0xff] }
  0x4b   :  { %1567 = vmatpush3.bf16.msra.mxu1 %v1566_v7  ;;  %v1572_v18 = vpack.c.bf16 %v561_v14, %v560_v11  ;;  %v544_v19 = vld [vmem:[%s3388_s3 + $0x20] sm:$0xff]  ;;  %v545_v20 = vld [vmem:[%s3388_s3 + $0x28] sm:$0xff]  ;;  %v1452_v21 = vpack.c.bf16 %v129_v13, %v127_v12  ;;  %v128_v22 = vld [vmem:[%s3386_s1 + $0x2b0] sm:$0xff] }
  0x4c   :  { %1569 = vmatprep.subr.bf16.mxu1 %v1568_v8  ;;  %v562_v23 = vld [vmem:[%s3388_s3 + $0xb0] sm:$0xff]  ;;  %v563_v24 = vld [vmem:[%s3388_s3 + $0xb8] sm:$0xff]  ;;  %v131_v25 = vld [vmem:[%s3386_s1 + $0x2c8] sm:$0xff]  ;;  %v1574_v27 = vpack.c.bf16 %v545_v20, %v544_v19  ;;  %v1454_v28 = vpack.c.bf16 %v128_v22, %v126_v17 }
  0x4d   :  { %1443 = vmatpush1.bf16.msra.mxu0 %v1442_v54  ;;  %v133_v26 = vld [vmem:[%s3386_s1 + $0x2d8] sm:$0xff]  ;;  %v130_v29 = vld [vmem:[%s3386_s1 + $0x2c0] sm:$0xff]  ;;  %v1576_v30 = vpack.c.bf16 %v563_v24, %v562_v23  ;;  %v546_v31 = vld [vmem:[%s3388_s3 + $0x30] sm:$0xff] }
  0x4e   :  { %1445 = vmatprep.subr.bf16.mxu0 %v1444_v55  ;;  %v547_v32 = vld [vmem:[%s3388_s3 + $0x38] sm:$0xff]  ;;  %v1456_v33 = vpack.c.bf16 %v133_v26, %v131_v25  ;;  %v132_v34 = vld [vmem:[%s3386_s1 + $0x2d0] sm:$0xff]  ;;  %v564_v35 = vld [vmem:[%s3388_s3 + $0xc0] sm:$0xff] }
  0x4f   :  { %1571 = vmatpush3.bf16.msra.mxu1 %v1570_v15  ;;  %v565_v36 = vld [vmem:[%s3388_s3 + $0xc8] sm:$0xff]  ;;  %v137_v38 = vld [vmem:[%s3386_s1 + $0x2f8] sm:$0xff]  ;;  %v1578_v39 = vpack.c.bf16 %v547_v32, %v546_v31  ;;  %v1458_v40 = vpack.c.bf16 %v132_v34, %v130_v29  ;;  %v134_v41 = vld [vmem:[%s3386_s1 + $0x2e0] sm:$0xff] }
  0x50   :  { %1573 = vmatprep.subr.bf16.mxu1 %v1572_v18  ;;  %v135_v37 = vld [vmem:[%s3386_s1 + $0x2e8] sm:$0xff]  ;;  %v1580_v42 = vpack.c.bf16 %v565_v36, %v564_v35  ;;  %v548_v43 = vld [vmem:[%s3388_s3 + $0x40] sm:$0xff]  ;;  %v136_v46 = vld [vmem:[%s3386_s1 + $0x2f0] sm:$0xff] }
  0x51   :  { %1447 = vmatpush1.bf16.msra.mxu0 %v1446_v1  ;;  %v549_v44 = vld [vmem:[%s3388_s3 + $0x48] sm:$0xff]  ;;  %v1460_v45 = vpack.c.bf16 %v137_v38, %v135_v37  ;;  %v566_v47 = vld [vmem:[%s3388_s3 + $0xd0] sm:$0xff]  ;;  %v567_v48 = vld [vmem:[%s3388_s3 + $0xd8] sm:$0xff]  ;;  %v1462_v52 = vpack.c.bf16 %v136_v46, %v134_v41 }
  0x52   :  { %1449 = vmatprep.subr.bf16.mxu0 %v1448_v6  ;;  %v139_v49 = vld [vmem:[%s3386_s1 + $0x308] sm:$0xff]  ;;  %v141_v50 = vld [vmem:[%s3386_s1 + $0x318] sm:$0xff]  ;;  %v1582_v51 = vpack.c.bf16 %v549_v44, %v548_v43  ;;  %v138_v53 = vld [vmem:[%s3386_s1 + $0x300] sm:$0xff]  ;;  %v1584_v54 = vpack.c.bf16 %v567_v48, %v566_v47 }
  0x53   :  { %1575 = vmatpush3.bf16.msra.mxu1 %v1574_v27  ;;  %v550_v55 = vld [vmem:[%s3388_s3 + $0x50] sm:$0xff]  ;;  %v551_v56 = vld [vmem:[%s3388_s3 + $0x58] sm:$0xff]  ;;  %v1464_v57 = vpack.c.bf16 %v141_v50, %v139_v49  ;;  %v568_v59 = vld [vmem:[%s3388_s3 + $0xe0] sm:$0xff] }
  0x54   :  { %1577 = vmatprep.subr.bf16.mxu1 %v1576_v30  ;;  %v140_v58 = vld [vmem:[%s3386_s1 + $0x310] sm:$0xff]  ;;  %v569_v60 = vld [vmem:[%s3388_s3 + $0xe8] sm:$0xff]  ;;  %v145_v62 = vld [vmem:[%s3386_s1 + $0x338] sm:$0xff]  ;;  %v1586_v63 = vpack.c.bf16 %v551_v56, %v550_v55 }
  0x55   :  { %1451 = vmatpush1.bf16.msra.mxu0 %v1450_v16  ;;  %v143_v61 = vld [vmem:[%s3386_s1 + $0x328] sm:$0xff]  ;;  %v1466_v0 = vpack.c.bf16 %v140_v58, %v138_v53  ;;  %v1588_v1 = vpack.c.bf16 %v569_v60, %v568_v59  ;;  %v142_v3 = vld [vmem:[%s3386_s1 + $0x320] sm:$0xff]  ;;  %v144_v4 = vld [vmem:[%s3386_s1 + $0x330] sm:$0xff] }
  0x56   :  { %1453 = vmatprep.subr.bf16.mxu0 %v1452_v21  ;;  %v1468_v2 = vpack.c.bf16 %v145_v62, %v143_v61  ;;  %v147_v5 = vld [vmem:[%s3386_s1 + $0x348] sm:$0xff]  ;;  %v149_v6 = vld [vmem:[%s3386_s1 + $0x358] sm:$0xff]  ;;  %v1470_v7 = vpack.c.bf16 %v144_v4, %v142_v3  ;;  %v146_v9 = vld [vmem:[%s3386_s1 + $0x340] sm:$0xff] }
  0x57   :  { %1579 = vmatpush3.bf16.msra.mxu1 %v1578_v39  ;;  %v1472_v8 = vpack.c.bf16 %v149_v6, %v147_v5  ;;  %v148_v10 = vld [vmem:[%s3386_s1 + $0x350] sm:$0xff]  ;;  %v151_v11 = vld [vmem:[%s3386_s1 + $0x368] sm:$0xff]  ;;  %v153_v12 = vld [vmem:[%s3386_s1 + $0x378] sm:$0xff] }
  0x58   :  { %1581 = vmatprep.subr.bf16.mxu1 %v1580_v42  ;;  %v1474_v13 = vpack.c.bf16 %v148_v10, %v146_v9  ;;  %v1476_v14 = vpack.c.bf16 %v153_v12, %v151_v11  ;;  %v150_v15 = vld [vmem:[%s3386_s1 + $0x360] sm:$0xff]  ;;  %v152_v16 = vld [vmem:[%s3386_s1 + $0x370] sm:$0xff]  ;;  %v155_v17 = vld [vmem:[%s3386_s1 + $0x388] sm:$0xff] }
  0x59   :  { %1455 = vmatpush1.bf16.msra.mxu0 %v1454_v28  ;;  %v157_v18 = vld [vmem:[%s3386_s1 + $0x398] sm:$0xff]  ;;  %v1478_v19 = vpack.c.bf16 %v152_v16, %v150_v15  ;;  %v154_v21 = vld [vmem:[%s3386_s1 + $0x380] sm:$0xff]  ;;  %v156_v22 = vld [vmem:[%s3386_s1 + $0x390] sm:$0xff] }
  0x5a   :  { %1457 = vmatprep.subr.bf16.mxu0 %v1456_v33  ;;  %v1480_v20 = vpack.c.bf16 %v157_v18, %v155_v17  ;;  %v159_v23 = vld [vmem:[%s3386_s1 + $0x3a8] sm:$0xff]  ;;  %v161_v24 = vld [vmem:[%s3386_s1 + $0x3b8] sm:$0xff]  ;;  %v1482_v25 = vpack.c.bf16 %v156_v22, %v154_v21  ;;  %v158_v27 = vld [vmem:[%s3386_s1 + $0x3a0] sm:$0xff] }
  0x5b   :  { %1583 = vmatpush3.bf16.msra.mxu1 %v1582_v51  ;;  %v1484_v26 = vpack.c.bf16 %v161_v24, %v159_v23  ;;  %v160_v28 = vld [vmem:[%s3386_s1 + $0x3b0] sm:$0xff]  ;;  %v163_v29 = vld [vmem:[%s3386_s1 + $0x3c8] sm:$0xff]  ;;  %v165_v30 = vld [vmem:[%s3386_s1 + $0x3d8] sm:$0xff] }
  0x5c   :  { %1585 = vmatprep.subr.bf16.mxu1 %v1584_v54  ;;  %v1486_v31 = vpack.c.bf16 %v160_v28, %v158_v27  ;;  %v1488_v32 = vpack.c.bf16 %v165_v30, %v163_v29  ;;  %v162_v33 = vld [vmem:[%s3386_s1 + $0x3c0] sm:$0xff]  ;;  %v164_v34 = vld [vmem:[%s3386_s1 + $0x3d0] sm:$0xff]  ;;  %v167_v35 = vld [vmem:[%s3386_s1 + $0x3e8] sm:$0xff] }
  0x5d   :  { %1459 = vmatpush1.bf16.msra.mxu0 %v1458_v40  ;;  %v169_v36 = vld [vmem:[%s3386_s1 + $0x3f8] sm:$0xff]  ;;  %v1490_v37 = vpack.c.bf16 %v164_v34, %v162_v33  ;;  %v166_v39 = vld [vmem:[%s3386_s1 + $0x3e0] sm:$0xff]  ;;  %v168_v40 = vld [vmem:[%s3386_s1 + $0x3f0] sm:$0xff] }
  0x5e   :  { %1461 = vmatprep.subr.bf16.mxu0 %v1460_v45  ;;  %v1492_v38 = vpack.c.bf16 %v169_v36, %v167_v35  ;;  %v171_v41 = vld [vmem:[%s3386_s1 + $0x408] sm:$0xff]  ;;  %v173_v42 = vld [vmem:[%s3386_s1 + $0x418] sm:$0xff]  ;;  %v1494_v43 = vpack.c.bf16 %v168_v40, %v166_v39  ;;  %v170_v45 = vld [vmem:[%s3386_s1 + $0x400] sm:$0xff] }
  0x5f   :  { %1587 = vmatpush3.bf16.msra.mxu1 %v1586_v63  ;;  %v1496_v44 = vpack.c.bf16 %v173_v42, %v171_v41  ;;  %v172_v46 = vld [vmem:[%s3386_s1 + $0x410] sm:$0xff]  ;;  %v175_v47 = vld [vmem:[%s3386_s1 + $0x428] sm:$0xff]  ;;  %v177_v48 = vld [vmem:[%s3386_s1 + $0x438] sm:$0xff] }
  0x60   :  { %1589 = vmatprep.subr.bf16.mxu1 %v1588_v1  ;;  %v37_v49 = vld [vmem:[%s3385_s0 + $0x10] sm:$0xff]  ;;  %v1498_v50 = vpack.c.bf16 %v172_v46, %v170_v45  ;;  %v1500_v51 = vpack.c.bf16 %v177_v48, %v175_v47  ;;  %v40_v54 = vld [vmem:[%s3385_s0 + $0x28] sm:$0xff]  ;;  %v181_v56 = vld [vmem:[%s3386_s1 + $0x458] sm:$0xff] }
  0x61   :  { %1463 = vmatpush1.bf16.msra.mxu0 %v1462_v52  ;;  %v174_v52 = vld [vmem:[%s3386_s1 + $0x420] sm:$0xff]  ;;  %v176_v53 = vld [vmem:[%s3386_s1 + $0x430] sm:$0xff]  ;;  %v179_v55 = vld [vmem:[%s3386_s1 + $0x448] sm:$0xff] }
  0x62   :  { %1465 = vmatprep.subr.bf16.mxu0 %v1464_v57  ;;  %v1502_v57 = vpack.c.bf16 %v176_v53, %v174_v52  ;;  %v1504_v58 = vpack.c.bf16 %v181_v56, %v179_v55  ;;  %v178_v59 = vld [vmem:[%s3386_s1 + $0x440] sm:$0xff]  ;;  %v180_v60 = vld [vmem:[%s3386_s1 + $0x450] sm:$0xff]  ;;  %v183_v61 = vld [vmem:[%s3386_s1 + $0x468] sm:$0xff] }
  0x63   :  { %v185_v62 = vld [vmem:[%s3386_s1 + $0x478] sm:$0xff]  ;;  %v1506_v63 = vpack.c.bf16 %v180_v60, %v178_v59  ;;  %v182_v1 = vld [vmem:[%s3386_s1 + $0x460] sm:$0xff]  ;;  %v187_v3 = vld [vmem:[%s3386_s1 + $0x488] sm:$0xff] }
  0x64   :  { %v189_v4 = vld [vmem:[%s3386_s1 + $0x498] sm:$0xff]  ;;  %v191_v9 = vld [vmem:[%s3386_s1 + $0x4a8] sm:$0xff]  ;;  %v218_v55 = vld [vmem:[%s3386_s1 + $0x580] sm:$0xff] }
  0x65   :  { %1467 = vmatpush1.bf16.msra.mxu0 %v1466_v0  ;;  %v1508_v0 = vpack.c.bf16 %v185_v62, %v183_v61  ;;  %v1512_v6 = vpack.c.bf16 %v189_v4, %v187_v3  ;;  %v193_v10 = vld [vmem:[%s3386_s1 + $0x4b8] sm:$0xff]  ;;  %v195_v15 = vld [vmem:[%s3386_s1 + $0x4c8] sm:$0xff]  ;;  %v220_v56 = vld [vmem:[%s3386_s1 + $0x590] sm:$0xff] }
  0x66   :  { %1469 = vmatprep.subr.bf16.mxu0 %v1468_v2  ;;  %v184_v2 = vld [vmem:[%s3386_s1 + $0x470] sm:$0xff]  ;;  %v1516_v12 = vpack.c.bf16 %v193_v10, %v191_v9  ;;  %v197_v16 = vld [vmem:[%s3386_s1 + $0x4d8] sm:$0xff]  ;;  %v199_v21 = vld [vmem:[%s3386_s1 + $0x4e8] sm:$0xff]  ;;  %v1546_v59 = vpack.c.bf16 %v220_v56, %v218_v55 }
  0x67   :  { %v1510_v5 = vpack.c.bf16 %v184_v2, %v182_v1  ;;  %v1520_v18 = vpack.c.bf16 %v197_v16, %v195_v15  ;;  %v201_v22 = vld [vmem:[%s3386_s1 + $0x4f8] sm:$0xff]  ;;  %v203_v27 = vld [vmem:[%s3386_s1 + $0x508] sm:$0xff]  ;;  %v222_v61 = vld [vmem:[%s3386_s1 + $0x5a0] sm:$0xff] }
  0x68   :  { %v1524_v24 = vpack.c.bf16 %v201_v22, %v199_v21  ;;  %v205_v28 = vld [vmem:[%s3386_s1 + $0x518] sm:$0xff]  ;;  %v207_v33 = vld [vmem:[%s3386_s1 + $0x528] sm:$0xff]  ;;  %v224_v62 = vld [vmem:[%s3386_s1 + $0x5b0] sm:$0xff] }
  0x69   :  { %1471 = vmatpush1.bf16.msra.mxu0 %v1470_v7  ;;  %v186_v7 = vld [vmem:[%s3386_s1 + $0x480] sm:$0xff]  ;;  %v1528_v30 = vpack.c.bf16 %v205_v28, %v203_v27  ;;  %v209_v34 = vld [vmem:[%s3386_s1 + $0x538] sm:$0xff]  ;;  %v211_v39 = vld [vmem:[%s3386_s1 + $0x548] sm:$0xff]  ;;  %v1550_v1 = vpack.c.bf16 %v224_v62, %v222_v61 }
  0x6a   :  { %1473 = vmatprep.subr.bf16.mxu0 %v1472_v8  ;;  %v188_v8 = vld [vmem:[%s3386_s1 + $0x490] sm:$0xff]  ;;  %v1532_v36 = vpack.c.bf16 %v209_v34, %v207_v33  ;;  %v213_v40 = vld [vmem:[%s3386_s1 + $0x558] sm:$0xff]  ;;  %v215_v45 = vld [vmem:[%s3386_s1 + $0x568] sm:$0xff] }
  0x6b   :  { %v1514_v11 = vpack.c.bf16 %v188_v8, %v186_v7  ;;  %v1536_v42 = vpack.c.bf16 %v213_v40, %v211_v39  ;;  %v217_v46 = vld [vmem:[%s3386_s1 + $0x578] sm:$0xff]  ;;  %v226_v3 = vld [vmem:[%s3386_s1 + $0x5c0] sm:$0xff]  ;;  %v228_v4 = vld [vmem:[%s3386_s1 + $0x5d0] sm:$0xff] }
  0x6c   :  { %v1540_v48 = vpack.c.bf16 %v217_v46, %v215_v45  ;;  %v221_v52 = vld [vmem:[%s3386_s1 + $0x598] sm:$0xff]  ;;  %v1554_v7 = vpack.c.bf16 %v228_v4, %v226_v3  ;;  %v230_v9 = vld [vmem:[%s3386_s1 + $0x5e0] sm:$0xff]  ;;  %v232_v10 = vld [vmem:[%s3386_s1 + $0x5f0] sm:$0xff] }
  0x6d   :  { %1475 = vmatpush1.bf16.msra.mxu0 %v1474_v13  ;;  %v190_v13 = vld [vmem:[%s3386_s1 + $0x4a0] sm:$0xff]  ;;  %v236_v16 = vld [vmem:[%s3386_s1 + $0x610] sm:$0xff]  ;;  %v553_v22 = vld [vmem:[%s3388_s3 + $0x68] sm:$0xff] }
  0x6e   :  { %1477 = vmatprep.subr.bf16.mxu0 %v1476_v14  ;;  %v192_v14 = vld [vmem:[%s3386_s1 + $0x4b0] sm:$0xff]  ;;  %v234_v15 = vld [vmem:[%s3386_s1 + $0x600] sm:$0xff]  ;;  %v555_v28 = vld [vmem:[%s3388_s3 + $0x78] sm:$0xff] }
  0x6f   :  { %v1518_v17 = vpack.c.bf16 %v192_v14, %v190_v13  ;;  %v1558_v13 = vpack.c.bf16 %v232_v10, %v230_v9  ;;  %v552_v21 = vld [vmem:[%s3388_s3 + $0x60] sm:$0xff]  ;;  %v554_v27 = vld [vmem:[%s3388_s3 + $0x70] sm:$0xff]  ;;  %v749_v55 = vld [vmem:[%s3392_s7 + $0xe8] sm:$0xff] }
  0x70   :  { %v238_v33 = vld [vmem:[%s3387_s2] sm:$0x3]  ;;  %v763_v61 = vld [vmem:[%s3392_s7 + $0x158] sm:$0xff]  ;;  %v770_v62 = vld [vmem:[%s3392_s7 + $0x190] sm:$0xff] }
  0x71   :  { %1479 = vmatpush1.bf16.msra.mxu0 %v1478_v19  ;;  %v194_v19 = vld [vmem:[%s3386_s1 + $0x4c0] sm:$0xff]  ;;  %v777_v3 = vld [vmem:[%s3392_s7 + $0x1c8] sm:$0xff] }
  0x72   :  { %1481 = vmatprep.subr.bf16.mxu0 %v1480_v20  ;;  %v196_v20 = vld [vmem:[%s3386_s1 + $0x4d0] sm:$0xff]  ;;  %v728_v45 = vld [vmem:[%s3392_s7 + $0x40] sm:$0xff] }
  0x73   :  { %v1522_v23 = vpack.c.bf16 %v196_v20, %v194_v19  ;;  %v1872_v19 = vmov 0.0   ;;  %v41_v20 = vld [vmem:[%s3385_s0 + $0x30] sm:$0xff]  ;;  %v720_v46 = vld [vmem:[%s3392_s7] sm:$0xff] }
  0x74   :  { %v756_v56 = vld [vmem:[%s3392_s7 + $0x120] sm:$0xff] }
  0x75   :  { %1483 = vmatpush1.bf16.msra.mxu0 %v1482_v25  ;;  %v198_v25 = vld [vmem:[%s3386_s1 + $0x4e0] sm:$0xff] }
  0x76   :  { %1485 = vmatprep.subr.bf16.mxu0 %v1484_v26  ;;  %v200_v26 = vld [vmem:[%s3386_s1 + $0x4f0] sm:$0xff]  ;;  %v784_v4 = vld [vmem:[%s3392_s7 + $0x200] sm:$0xff] }
  0x77   :  { %v1526_v29 = vpack.c.bf16 %v200_v26, %v198_v25  ;;  %v571_v25 = vld [vmem:[%s3388_s3 + $0xf8] sm:$0xff]  ;;  %v1612_v9 = vpack.c.bf16 %v784_v4, %v777_v3  ;;  %v776_v10 = vld [vmem:[%s3392_s7 + $0x1c0] sm:$0xff]  ;;  %v854_v3 = vld [vmem:[%s3392_s7 + $0x430] sm:$0xff] }
  0x79   :  { %1487 = vmatpush1.bf16.msra.mxu0 %v1486_v31  ;;  %v202_v31 = vld [vmem:[%s3386_s1 + $0x500] sm:$0xff] }
  0x7a   :  { %1489 = vmatprep.subr.bf16.mxu0 %v1488_v32  ;;  %v204_v32 = vld [vmem:[%s3386_s1 + $0x510] sm:$0xff] }
  0x7b   :  { %v1530_v35 = vpack.c.bf16 %v204_v32, %v202_v31 }
  0x7d   :  { %1491 = vmatpush1.bf16.msra.mxu0 %v1490_v37  ;;  %v206_v37 = vld [vmem:[%s3386_s1 + $0x520] sm:$0xff] }
  0x7e   :  { %1493 = vmatprep.subr.bf16.mxu0 %v1492_v38  ;;  %v208_v38 = vld [vmem:[%s3386_s1 + $0x530] sm:$0xff] }
  0x7f   :  { %v1534_v41 = vpack.c.bf16 %v208_v38, %v206_v37 }
  0x81   :  { %1495 = vmatpush1.bf16.msra.mxu0 %v1494_v43  ;;  %v210_v43 = vld [vmem:[%s3386_s1 + $0x540] sm:$0xff] }
  0x82   :  { %1497 = vmatprep.subr.bf16.mxu0 %v1496_v44  ;;  %v212_v44 = vld [vmem:[%s3386_s1 + $0x550] sm:$0xff] }
  0x83   :  { %v1538_v47 = vpack.c.bf16 %v212_v44, %v210_v43  ;;  %v1873_v43 = vmov 0   ;;  %v721_v44 = vld [vmem:[%s3392_s7 + $0x8] sm:$0xff] }
  0x84   :  { %390 = vmatmul.mubr.f32.vlgmr.msra.gmra.mrb[0].mxu0 %v37_v49  ;;  %v214_v49 = vld [vmem:[%s3386_s1 + $0x560] sm:$0xff]  ;;  %1832 = vset.pattern.permute.xlu0 %v1873_v43  ;;  %v811_v43 = vld [vmem:[%s3392_s7 + $0x2d8] sm:$0xff] }
  0x85   :  { %1499 = vmatpush1.bf16.msra.mxu0 %v1498_v50  ;;  %460 = vmatprep.mubr.f32.mxu0 %v40_v54  ;;  %v216_v50 = vld [vmem:[%s3386_s1 + $0x570] sm:$0xff] }
  0x86   :  { %1501 = vmatprep.subr.bf16.mxu0 %v1500_v51  ;;  %v219_v51 = vld [vmem:[%s3386_s1 + $0x588] sm:$0xff]  ;;  %v1542_v53 = vpack.c.bf16 %v216_v50, %v214_v49  ;;  %v735_v49 = vld [vmem:[%s3392_s7 + $0x78] sm:$0xff]  ;;  %v742_v50 = vld [vmem:[%s3392_s7 + $0xb0] sm:$0xff] }
  0x87   :  { %v1544_v54 = vpack.c.bf16 %v221_v52, %v219_v51  ;;  %v1600_v52 = vpack.c.bf16 %v742_v50, %v735_v49  ;;  %v894_v49 = vld [vmem:[%s3392_s7 + $0x570] sm:$0xff]  ;;  %v901_v50 = vld [vmem:[%s3392_s7 + $0x5a8] sm:$0xff] }
  0x89   :  { %1503 = vmatpush1.bf16.msra.mxu0 %v1502_v57  ;;  %v223_v57 = vld [vmem:[%s3386_s1 + $0x5a8] sm:$0xff] }
  0x8a   :  { %1505 = vmatprep.subr.bf16.mxu0 %v1504_v58  ;;  %v225_v58 = vld [vmem:[%s3386_s1 + $0x5b8] sm:$0xff] }
  0x8b   :  { %v1548_v60 = vpack.c.bf16 %v225_v58, %v223_v57  ;;  %v1604_v58 = vpack.c.bf16 %v756_v56, %v749_v55  ;;  %v825_v55 = vld [vmem:[%s3392_s7 + $0x348] sm:$0xff]  ;;  %v1804_v56 = vpack.c.bf16 %v901_v50, %v894_v49  ;;  %v916_v50 = vld [vmem:[%s3392_s7 + $0x620] sm:$0xff] }
  0x8d   :  { %1507 = vmatpush1.bf16.msra.mxu0 %v1506_v63  ;;  %v227_v63 = vld [vmem:[%s3386_s1 + $0x5c8] sm:$0xff] }
  0x8e   :  { %1509 = vmatprep.subr.bf16.mxu0 %v1508_v0  ;;  %v229_v0 = vld [vmem:[%s3386_s1 + $0x5d8] sm:$0xff] }
  0x8f   :  { %v1552_v2 = vpack.c.bf16 %v229_v0, %v227_v63  ;;  %v1608_v0 = vpack.c.bf16 %v770_v62, %v763_v61 }
  0x91   :  { %1511 = vmatpush1.bf16.msra.mxu0 %v1510_v5  ;;  %v231_v5 = vld [vmem:[%s3386_s1 + $0x5e8] sm:$0xff] }
  0x92   :  { %1513 = vmatprep.subr.bf16.mxu0 %v1512_v6  ;;  %v233_v6 = vld [vmem:[%s3386_s1 + $0x5f8] sm:$0xff] }
  0x93   :  { %v1556_v8 = vpack.c.bf16 %v233_v6, %v231_v5  ;;  %v838_v6 = vld [vmem:[%s3392_s7 + $0x3b0] sm:$0xff] }
  0x95   :  { %1515 = vmatpush1.bf16.msra.mxu0 %v1514_v11  ;;  %v235_v11 = vld [vmem:[%s3386_s1 + $0x608] sm:$0xff] }
  0x96   :  { %1517 = vmatprep.subr.bf16.mxu0 %v1516_v12  ;;  %v237_v12 = vld [vmem:[%s3386_s1 + $0x618] sm:$0xff] }
  0x97   :  { %v1560_v14 = vpack.c.bf16 %v237_v12, %v235_v11  ;;  %v783_v11 = vld [vmem:[%s3392_s7 + $0x1f8] sm:$0xff] }
  0x99   :  { %1519 = vmatpush1.bf16.msra.mxu0 %v1518_v17  ;;  %v39_v17 = vld [vmem:[%s3385_s0 + $0x20] sm:$0xff] }
  0x9a   :  { %1521 = vmatprep.subr.bf16.mxu0 %v1520_v18  ;;  %v1562_v18 = vpack.c.bf16 %v236_v16, %v234_v15  ;;  %v798_v15 = vld [vmem:[%s3392_s7 + $0x270] sm:$0xff] }
  0x9d   :  { %1523 = vmatpush1.bf16.msra.mxu0 %v1522_v23  ;;  %v1590_v23 = vpack.c.bf16 %v553_v22, %v552_v21  ;;  %v1614_v21 = vpack.c.bf16 %v783_v11, %v776_v10  ;;  %v790_v22 = vld [vmem:[%s3392_s7 + $0x230] sm:$0xff] }
  0x9e   :  { %1525 = vmatprep.subr.bf16.mxu0 %v1524_v24  ;;  %v570_v24 = vld [vmem:[%s3388_s3 + $0xf0] sm:$0xff] }
  0x9f   :  { %1591 = vmatpush3.bf16.msra.mxu1 %v1590_v23  ;;  %v1592_v26 = vpack.c.bf16 %v571_v25, %v570_v24  ;;  %v797_v23 = vld [vmem:[%s3392_s7 + $0x268] sm:$0xff] }
  0xa1   :  { %1527 = vmatpush1.bf16.msra.mxu0 %v1526_v29  ;;  %v1594_v29 = vpack.c.bf16 %v555_v28, %v554_v27  ;;  %1593 = vmatprep.subr.bf16.mxu1 %v1592_v26  ;;  %v805_v27 = vld [vmem:[%s3392_s7 + $0x2a8] sm:$0xff]  ;;  %v866_v28 = vld [vmem:[%s3392_s7 + $0x490] sm:$0xff] }
  0xa2   :  { %1529 = vmatprep.subr.bf16.mxu0 %v1528_v30  ;;  %v240_v30 = vlaneseq }
  0xa3   :  { %1595 = vmatpush3.bf16.msra.mxu1 %v1594_v29  ;;  %v873_v29 = vld [vmem:[%s3392_s7 + $0x4c8] sm:$0xff] }
  0xa4   :  { %v2637_v31 = vshrl.u32 %v240_v30, 7  ;;  %v812_v30 = vld [vmem:[%s3392_s7 + $0x2e0] sm:$0xff] }
  0xa5   :  { %1531 = vmatpush1.bf16.msra.mxu0 %v1530_v35 }
  0xa6   :  { %1533 = vmatprep.subr.bf16.mxu0 %v1532_v36  ;;  %v2640_v32 = vsub.s32 0, %v2637_v31  ;;  %v2646_v34 = vsub.s32 1, %v2637_v31 }
  0xa8   :  { %v243_v35 = vrot.slane %v238_v33, %v2640_v32  ;;  %v247_v36 = vrot.slane %v238_v33, %v2646_v34  ;;  %v1796_v33 = vpack.c.bf16 %v873_v29, %v866_v28  ;;  %v1297_v28 = vld [vmem:[%s3389_s4] ss:$0 sm:$0xff] }
  0xa9   :  { %1535 = vmatpush1.bf16.msra.mxu0 %v1534_v41 }
  0xaa   :  { %1537 = vmatprep.subr.bf16.mxu0 %v1536_v42 }
  0xad   :  { %1539 = vmatpush1.bf16.msra.mxu0 %v1538_v47  ;;  %v1596_v47 = vpack.c.bf16 %v728_v45, %v721_v44  ;;  %v768_v45 = vld [vmem:[%s3392_s7 + $0x180] sm:$0xff] }
  0xae   :  { %1541 = vmatprep.subr.bf16.mxu0 %v1540_v48  ;;  %v727_v48 = vld [vmem:[%s3392_s7 + $0x38] sm:$0xff] }
  0xaf   :  { %v1598_v51 = vpack.c.bf16 %v727_v48, %v720_v46  ;;  %1597 = vmatprep.subr.bf16.mxu1 %v1596_v47  ;;  %v775_v46 = vld [vmem:[%s3392_s7 + $0x1b8] sm:$0xff]  ;;  %v826_v48 = vld [vmem:[%s3392_s7 + $0x350] sm:$0xff] }
  0xb0   :  { %v819_v47 = vld [vmem:[%s3392_s7 + $0x318] sm:$0xff] }
  0xb1   :  { %1543 = vmatpush1.bf16.msra.mxu0 %v1542_v53  ;;  %v734_v53 = vld [vmem:[%s3392_s7 + $0x70] sm:$0xff] }
  0xb2   :  { %1545 = vmatprep.subr.bf16.mxu0 %v1544_v54  ;;  %v741_v54 = vld [vmem:[%s3392_s7 + $0xa8] sm:$0xff] }
  0xb3   :  { %v1602_v57 = vpack.c.bf16 %v741_v54, %v734_v53  ;;  %v1802_v53 = vpack.c.bf16 %v775_v46, %v768_v45  ;;  %v1624_v54 = vpack.c.bf16 %v826_v48, %v819_v47  ;;  %v917_v47 = vld [vmem:[%s3392_s7 + $0x628] sm:$0xff]  ;;  %v924_v48 = vld [vmem:[%s3392_s7 + $0x660] sm:$0xff] }
  0xb4   :  { %v1652_v49 = vpack.c.bf16 %v924_v48, %v917_v47  ;;  %v743_v47 = vld [vmem:[%s3392_s7 + $0xb8] sm:$0xff] }
  0xb5   :  { %1547 = vmatpush1.bf16.msra.mxu0 %v1546_v59  ;;  %v748_v59 = vld [vmem:[%s3392_s7 + $0xe0] sm:$0xff]  ;;  %v751_v48 = vld [vmem:[%s3392_s7 + $0xf8] sm:$0xff] }
  0xb6   :  { %1549 = vmatprep.subr.bf16.mxu0 %v1548_v60  ;;  %v755_v60 = vld [vmem:[%s3392_s7 + $0x118] sm:$0xff] }
  0xb7   :  { %v1606_v63 = vpack.c.bf16 %v755_v60, %v748_v59  ;;  %v833_v59 = vld [vmem:[%s3392_s7 + $0x388] sm:$0xff]  ;;  %v840_v60 = vld [vmem:[%s3392_s7 + $0x3c0] sm:$0xff] }
  0xb9   :  { %1551 = vmatpush1.bf16.msra.mxu0 %v1550_v1  ;;  %v762_v1 = vld [vmem:[%s3392_s7 + $0x150] sm:$0xff] }
  0xba   :  { %1553 = vmatprep.subr.bf16.mxu0 %v1552_v2  ;;  %v769_v2 = vld [vmem:[%s3392_s7 + $0x188] sm:$0xff] }
  0xbb   :  { %v1610_v5 = vpack.c.bf16 %v769_v2, %v762_v1  ;;  %v839_v1 = vld [vmem:[%s3392_s7 + $0x3b8] sm:$0xff] }
  0xbc   :  { %v847_v2 = vld [vmem:[%s3392_s7 + $0x3f8] sm:$0xff] }
  0xbd   :  { %1555 = vmatpush1.bf16.msra.mxu0 %v1554_v7  ;;  %v845_v7 = vld [vmem:[%s3392_s7 + $0x3e8] sm:$0xff] }
  0xbe   :  { %1557 = vmatprep.subr.bf16.mxu0 %v1556_v8  ;;  %v726_v8 = vld [vmem:[%s3392_s7 + $0x30] sm:$0xff]  ;;  %v1788_v12 = vpack.c.bf16 %v845_v7, %v838_v6  ;;  %v853_v7 = vld [vmem:[%s3392_s7 + $0x428] sm:$0xff] }
  0xbf   :  { %v846_v6 = vld [vmem:[%s3392_s7 + $0x3f0] sm:$0xff] }
  0xc0   :  { %v1634_v10 = vpack.c.bf16 %v853_v7, %v846_v6 }
  0xc1   :  { %1559 = vmatpush1.bf16.msra.mxu0 %v1558_v13  ;;  %v733_v13 = vld [vmem:[%s3392_s7 + $0x68] sm:$0xff] }
  0xc2   :  { %1561 = vmatprep.subr.bf16.mxu0 %v1560_v14  ;;  %v791_v14 = vld [vmem:[%s3392_s7 + $0x238] sm:$0xff]  ;;  %v1790_v16 = vpack.c.bf16 %v733_v13, %v726_v8  ;;  %v861_v8 = vld [vmem:[%s3392_s7 + $0x468] sm:$0xff] }
  0xc3   :  { %v1616_v26 = vpack.c.bf16 %v798_v15, %v791_v14  ;;  %v867_v13 = vld [vmem:[%s3392_s7 + $0x498] sm:$0xff]  ;;  %v882_v15 = vld [vmem:[%s3392_s7 + $0x510] sm:$0xff] }
  0xc4   :  { %461 = vmatmul.mubr.f32.vlgmr.msra.gmra.mrb[0].mxu0 %v39_v17  ;;  %v852_v17 = vld [vmem:[%s3392_s7 + $0x420] sm:$0xff]  ;;  %v875_v14 = vld [vmem:[%s3392_s7 + $0x4d8] sm:$0xff] }
  0xc5   :  { %1563 = vmatpush1.bf16.msra.mxu0 %v1562_v18  ;;  %531 = vmatprep.mubr.f32.mxu0 %v1872_v19  ;;  %v859_v18 = vld [vmem:[%s3392_s7 + $0x458] sm:$0xff]  ;;  %v740_v19 = vld [vmem:[%s3392_s7 + $0xa0] sm:$0xff] }
  0xc6   :  { %1789 = vmatprep.subr.bf16.mxu0 %v1788_v12  ;;  %v1792_v24 = vpack.c.bf16 %v859_v18, %v852_v17  ;;  %v860_v12 = vld [vmem:[%s3392_s7 + $0x460] sm:$0xff]  ;;  %v1640_v17 = vpack.c.bf16 %v882_v15, %v875_v14  ;;  %v874_v18 = vld [vmem:[%s3392_s7 + $0x4d0] sm:$0xff] }
  0xcc   :  { %1296 = vmatmul.mubr.msk.f32.vlgmr.msra.gmra.mrb[0].mxu0 %vm250_vm0, %v41_v20  ;;  %v747_v20 = vld [vmem:[%s3392_s7 + $0xd8] sm:$0xff] }
  0xcd   :  { %1791 = vmatpush3.bf16.msra.mxu0 %v1790_v16  ;;  %v1794_v25 = vpack.c.bf16 %v747_v20, %v740_v19  ;;  %v1638_v16 = vpack.c.bf16 %v867_v13, %v860_v12  ;;  %v881_v19 = vld [vmem:[%s3392_s7 + $0x508] sm:$0xff]  ;;  %v688_v12 = vsub.s32 3, %v2637_v31  ;;  %v651_v13 = vld [vmem:[%s3390_s5] sm:$0xf] }
  0xce   :  { %1793 = vmatprep.subr.bf16.mxu0 %v1792_v24  ;;  %v889_v20 = vld [vmem:[%s3392_s7 + $0x548] sm:$0xff]  ;;  %v888_v24 = vld [vmem:[%s3392_s7 + $0x540] sm:$0xff]  ;;  %v661_v14 = vrot.slane %v651_v13, %v2640_v32 }
  0xd1   :  { %1795 = vmatpush3.bf16.msra.mxu0 %v1794_v25  ;;  %v895_v25 = vld [vmem:[%s3392_s7 + $0x578] sm:$0xff] }
  0xd2   :  { %1797 = vmatprep.subr.bf16.mxu0 %v1796_v33 }
 0x19f   :  { %v533_v37 = vpop.f32.mrb[0].mxu0 }
 0x1a0   :  { %v1820_v38 = vadd.f32 %v533_v37, %v243_v35  ;;  %v535_v39 = vpop.f32.mrb[1].mxu0  ;;  %v754_v35 = vld [vmem:[%s3392_s7 + $0x110] sm:$0xff]  ;;  %v1618_v37 = vpack.c.bf16 %v797_v23, %v790_v22  ;;  %v1642_v22 = vpack.c.bf16 %v881_v19, %v874_v18  ;;  %v671_v19 = vrot.slane %v661_v14, %v2640_v32 }
 0x1a1   :  { %v1821_v40 = vadd.f32 %v535_v39, %v247_v36  ;;  %v761_v36 = vld [vmem:[%s3392_s7 + $0x148] sm:$0xff]  ;;  %v806_v14 = vld [vmem:[%s3392_s7 + $0x2b0] sm:$0xff] }
 0x1a2   :  { %v538_v42 = vmax.f32 %v1820_v38, 0.0  ;;  %v804_v38 = vld [vmem:[%s3392_s7 + $0x2a0] sm:$0xff]  ;;  %v1798_v39 = vpack.c.bf16 %v761_v36, %v754_v35  ;;  %v903_v35 = vld [vmem:[%s3392_s7 + $0x5b8] sm:$0xff]  ;;  %v910_v36 = vld [vmem:[%s3392_s7 + $0x5f0] sm:$0xff] }
 0x1a3   :  { %v539_v41 = vmax.f32 %v1821_v40, 0.0  ;;  %v880_v40 = vld [vmem:[%s3392_s7 + $0x500] sm:$0xff] }
 0x1a4   :  { %1799 = vmatpush3.bf16.msra.mxu0 %v1798_v39  ;;  %v909_v39 = vld [vmem:[%s3392_s7 + $0x5e8] sm:$0xff] }
 0x1a5   :  { %643 = vmatprep.mubr.f32.mxu1 %v539_v41  ;;  %v887_v41 = vld [vmem:[%s3392_s7 + $0x538] sm:$0xff] }
 0x1a6   :  { %644 = vmatmul.mubr.f32.vlgmr.msra.gmra.mrb[0].mxu1 %v538_v42  ;;  %v1620_v42 = vpack.c.bf16 %v812_v30, %v805_v27  ;;  %v1800_v44 = vpack.c.bf16 %v887_v41, %v880_v40  ;;  %v908_v40 = vld [vmem:[%s3392_s7 + $0x5e0] sm:$0xff] }
 0x1a7   :  { %1599 = vmatpush1.bf16.msra.mxu1 %v1598_v51  ;;  %v1622_v51 = vpack.c.bf16 %v811_v43, %v804_v38  ;;  %v902_v38 = vld [vmem:[%s3392_s7 + $0x5b0] sm:$0xff]  ;;  %v796_v43 = vld [vmem:[%s3392_s7 + $0x260] sm:$0xff] }
 0x1a8   :  { %1601 = vmatprep.subr.bf16.mxu1 %v1600_v52  ;;  %v818_v52 = vld [vmem:[%s3392_s7 + $0x310] sm:$0xff]  ;;  %1801 = vmatprep.subr.bf16.mxu0 %v1800_v44  ;;  %v1650_v41 = vpack.c.bf16 %v909_v39, %v902_v38  ;;  %v803_v44 = vld [vmem:[%s3392_s7 + $0x298] sm:$0xff] }
 0x1a9   :  { %v1626_v61 = vpack.c.bf16 %v825_v55, %v818_v52  ;;  %1803 = vmatpush3.bf16.msra.mxu0 %v1802_v53  ;;  %v1810_v46 = vpack.c.bf16 %v803_v44, %v796_v43  ;;  %v922_v52 = vld [vmem:[%s3392_s7 + $0x650] sm:$0xff]  ;;  %v1874_v53 = vmov 1   ;;  %v929_v55 = vld [vmem:[%s3392_s7 + $0x688] sm:$0xff] }
 0x1aa   :  { %1805 = vmatprep.subr.bf16.mxu0 %v1804_v56  ;;  %v810_v56 = vld [vmem:[%s3392_s7 + $0x2d0] sm:$0xff] }
 0x1ab   :  { %1603 = vmatpush1.bf16.msra.mxu1 %v1602_v57  ;;  %v782_v57 = vld [vmem:[%s3392_s7 + $0x1f0] sm:$0xff] }
 0x1ac   :  { %1605 = vmatprep.subr.bf16.mxu1 %v1604_v58  ;;  %v789_v58 = vld [vmem:[%s3392_s7 + $0x228] sm:$0xff] }
 0x1ad   :  { %v1806_v62 = vpack.c.bf16 %v789_v58, %v782_v57  ;;  %v817_v57 = vld [vmem:[%s3392_s7 + $0x308] sm:$0xff]  ;;  %v1812_v58 = vpack.c.bf16 %v929_v55, %v922_v52  ;;  %v750_v52 = vld [vmem:[%s3392_s7 + $0xf0] sm:$0xff]  ;;  %v772_v55 = vld [vmem:[%s3392_s7 + $0x1a0] sm:$0xff] }
 0x1af   :  { %1607 = vmatpush1.bf16.msra.mxu1 %v1606_v63  ;;  %v1628_v63 = vpack.c.bf16 %v840_v60, %v833_v59  ;;  %1807 = vmatpush3.bf16.msra.mxu0 %v1806_v62  ;;  %v1814_v59 = vpack.c.bf16 %v817_v57, %v810_v56  ;;  %v931_v60 = vld [vmem:[%s3392_s7 + $0x698] sm:$0xff] }
 0x1b0   :  { %1609 = vmatprep.subr.bf16.mxu1 %v1608_v0  ;;  %v832_v0 = vld [vmem:[%s3392_s7 + $0x380] sm:$0xff] }
 0x1b1   :  { %v1630_v4 = vpack.c.bf16 %v839_v1, %v832_v0  ;;  %v937_v0 = vld [vmem:[%s3392_s7 + $0x6c8] sm:$0xff]  ;;  %v936_v1 = vld [vmem:[%s3392_s7 + $0x6c0] sm:$0xff] }
 0x1b3   :  { %1611 = vmatpush1.bf16.msra.mxu1 %v1610_v5  ;;  %v1632_v5 = vpack.c.bf16 %v854_v3, %v847_v2  ;;  %v943_v3 = vld [vmem:[%s3392_s7 + $0x6f8] sm:$0xff] }
 0x1b4   :  { %1613 = vmatprep.subr.bf16.mxu1 %v1612_v9  ;;  %v868_v9 = vld [vmem:[%s3392_s7 + $0x4a0] sm:$0xff]  ;;  %v1816_v6 = vpack.c.bf16 %v943_v3, %v936_v1  ;;  %v785_v1 = vld [vmem:[%s3392_s7 + $0x208] sm:$0xff] }
 0x1b5   :  { %v1636_v11 = vpack.c.bf16 %v868_v9, %v861_v8  ;;  %v723_v8 = vld [vmem:[%s3392_s7 + $0x18] sm:$0xff]  ;;  %v730_v9 = vld [vmem:[%s3392_s7 + $0x50] sm:$0xff]  ;;  %v800_v3 = vld [vmem:[%s3392_s7 + $0x280] sm:$0xff] }
 0x1b7   :  { %1615 = vmatpush1.bf16.msra.mxu1 %v1614_v21  ;;  %v896_v21 = vld [vmem:[%s3392_s7 + $0x580] sm:$0xff] }
 0x1b8   :  { %1617 = vmatprep.subr.bf16.mxu1 %v1616_v26  ;;  %v1644_v23 = vpack.c.bf16 %v896_v21, %v889_v20  ;;  %v1646_v26 = vpack.c.bf16 %v895_v25, %v888_v24 }
 0x1bb   :  { %1619 = vmatpush1.bf16.msra.mxu1 %v1618_v37  ;;  %v1648_v37 = vpack.c.bf16 %v910_v36, %v903_v35  ;;  %v722_v36 = vld [vmem:[%s3392_s7 + $0x10] sm:$0xff] }
 0x1bc   :  { %1621 = vmatprep.subr.bf16.mxu1 %v1620_v42  ;;  %v915_v42 = vld [vmem:[%s3392_s7 + $0x618] sm:$0xff] }
 0x1bd   :  { %v1808_v45 = vpack.c.bf16 %v915_v42, %v908_v40  ;;  %v737_v40 = vld [vmem:[%s3392_s7 + $0x88] sm:$0xff] }
 0x1bf   :  { %1623 = vmatpush1.bf16.msra.mxu1 %v1622_v51  ;;  %1809 = vmatprep.subr.bf16.mxu0 %v1808_v45  ;;  %v923_v51 = vld [vmem:[%s3392_s7 + $0x658] sm:$0xff] }
 0x1c0   :  { %1625 = vmatprep.subr.bf16.mxu1 %v1624_v54  ;;  %1811 = vmatpush3.bf16.msra.mxu0 %v1810_v46  ;;  %v1654_v54 = vpack.c.bf16 %v923_v51, %v916_v50  ;;  %v736_v46 = vld [vmem:[%s3392_s7 + $0x80] sm:$0xff] }
 0x1c1   :  { %1813 = vmatprep.subr.bf16.mxu0 %v1812_v58  ;;  %v1666_v50 = vpack.c.bf16 %v743_v47, %v736_v46  ;;  %v764_v58 = vld [vmem:[%s3392_s7 + $0x160] sm:$0xff] }
 0x1c2   :  { %v884_v46 = vld [vmem:[%s3392_s7 + $0x520] sm:$0xff] }
 0x1c3   :  { %1627 = vmatpush1.bf16.msra.mxu1 %v1626_v61  ;;  %v938_v61 = vld [vmem:[%s3392_s7 + $0x6d0] sm:$0xff] }
 0x1c4   :  { %1629 = vmatprep.subr.bf16.mxu1 %v1628_v63  ;;  %v1656_v62 = vpack.c.bf16 %v938_v61, %v931_v60  ;;  %v930_v63 = vld [vmem:[%s3392_s7 + $0x690] sm:$0xff]  ;;  %1815 = vmatpush3.bf16.msra.mxu0 %v1814_v59  ;;  %v771_v59 = vld [vmem:[%s3392_s7 + $0x198] sm:$0xff] }
 0x1c5   :  { %v1658_v2 = vpack.c.bf16 %v937_v0, %v930_v63  ;;  %1817 = vmatprep.subr.bf16.mxu0 %v1816_v6  ;;  %v779_v60 = vld [vmem:[%s3392_s7 + $0x1d8] sm:$0xff]  ;;  %v786_v61 = vld [vmem:[%s3392_s7 + $0x210] sm:$0xff]  ;;  %v792_v6 = vld [vmem:[%s3392_s7 + $0x240] sm:$0xff] }
 0x1c6   :  { %v1676_v63 = vpack.c.bf16 %v786_v61, %v779_v60  ;;  %v778_v0 = vld [vmem:[%s3392_s7 + $0x1d0] sm:$0xff]  ;;  %v904_v61 = vld [vmem:[%s3392_s7 + $0x5c0] sm:$0xff] }
 0x1c7   :  { %1631 = vmatpush1.bf16.msra.mxu1 %v1630_v4  ;;  %v824_v4 = vld [vmem:[%s3392_s7 + $0x340] sm:$0xff] }
 0x1c8   :  { %1633 = vmatprep.subr.bf16.mxu1 %v1632_v5  ;;  %v831_v5 = vld [vmem:[%s3392_s7 + $0x378] sm:$0xff] }
 0x1c9   :  { %v1818_v7 = vpack.c.bf16 %v831_v5, %v824_v4  ;;  %v1678_v4 = vpack.c.bf16 %v785_v1, %v778_v0  ;;  %v926_v0 = vld [vmem:[%s3392_s7 + $0x670] sm:$0xff] }
 0x1cb   :  { %1635 = vmatpush1.bf16.msra.mxu1 %v1634_v10  ;;  %v1660_v10 = vpack.c.bf16 %v730_v9, %v723_v8  ;;  %1819 = vmatpush3.bf16.msra.mxu0 %v1818_v7  ;;  %v799_v7 = vld [vmem:[%s3392_s7 + $0x278] sm:$0xff]  ;;  %v814_v9 = vld [vmem:[%s3392_s7 + $0x2f0] sm:$0xff] }
 0x1cc   :  { %1637 = vmatprep.subr.bf16.mxu1 %v1636_v11  ;;  %v664_v11 = vsub.s32 2, %v2637_v31  ;;  %v807_v8 = vld [vmem:[%s3392_s7 + $0x2b8] sm:$0xff] }
 0x1ce   :  { %v665_v15 = vrot.slane %v651_v13, %v664_v11 }
 0x1cf   :  { %1639 = vmatpush1.bf16.msra.mxu1 %v1638_v16  ;;  %v685_v16 = vrot.slane %v651_v13, %v2646_v34 }
 0x1d0   :  { %1641 = vmatprep.subr.bf16.mxu1 %v1640_v17  ;;  %v689_v17 = vrot.slane %v651_v13, %v688_v12  ;;  %v675_v20 = vrot.slane %v665_v15, %v2640_v32  ;;  %v1684_v13 = vpack.c.bf16 %v814_v9, %v807_v8  ;;  %v813_v15 = vld [vmem:[%s3392_s7 + $0x2e8] sm:$0xff]  ;;  %v932_v9 = vld [vmem:[%s3392_s7 + $0x6a0] sm:$0xff] }
 0x1d1   :  { %v695_v21 = vrot.slane %v685_v16, %v2646_v34  ;;  %v821_v16 = vld [vmem:[%s3392_s7 + $0x328] sm:$0xff] }
 0x1d3   :  { %1643 = vmatpush1.bf16.msra.mxu1 %v1642_v22  ;;  %v699_v22 = vrot.slane %v689_v17, %v2646_v34  ;;  %v828_v17 = vld [vmem:[%s3392_s7 + $0x360] sm:$0xff] }
 0x1d4   :  { %1645 = vmatprep.subr.bf16.mxu1 %v1644_v23  ;;  %v704_v23 = vld [vmem:[%s3391_s6] sm:$0x3] }
 0x1d5   :  { %v709_v24 = vrot.slane %v704_v23, %v2640_v32  ;;  %v713_v25 = vrot.slane %v704_v23, %v2646_v34  ;;  %v842_v23 = vld [vmem:[%s3392_s7 + $0x3d0] sm:$0xff] }
 0x1d7   :  { %1647 = vmatpush1.bf16.msra.mxu1 %v1646_v26 }
 0x1d8   :  { %1649 = vmatprep.subr.bf16.mxu1 %v1648_v37  ;;  %v729_v37 = vld [vmem:[%s3392_s7 + $0x48] sm:$0xff] }
 0x1d9   :  { %v1662_v44 = vpack.c.bf16 %v729_v37, %v722_v36  ;;  %v855_v36 = vld [vmem:[%s3392_s7 + $0x438] sm:$0xff] }
 0x1da   :  { %v863_v37 = vld [vmem:[%s3392_s7 + $0x478] sm:$0xff] }
 0x1db   :  { %1651 = vmatpush1.bf16.msra.mxu1 %v1650_v41  ;;  %v744_v41 = vld [vmem:[%s3392_s7 + $0xc0] sm:$0xff] }
 0x1dc   :  { %1653 = vmatprep.subr.bf16.mxu1 %v1652_v49  ;;  %v1664_v45 = vpack.c.bf16 %v744_v41, %v737_v40  ;;  %v758_v49 = vld [vmem:[%s3392_s7 + $0x130] sm:$0xff] }
 0x1dd   :  { %v1668_v51 = vpack.c.bf16 %v758_v49, %v751_v48  ;;  %v862_v41 = vld [vmem:[%s3392_s7 + $0x470] sm:$0xff]  ;;  %v876_v49 = vld [vmem:[%s3392_s7 + $0x4e0] sm:$0xff] }
 0x1df   :  { %1655 = vmatpush1.bf16.msra.mxu1 %v1654_v54  ;;  %v765_v54 = vld [vmem:[%s3392_s7 + $0x168] sm:$0xff] }
 0x1e0   :  { %1657 = vmatprep.subr.bf16.mxu1 %v1656_v62  ;;  %v1672_v57 = vpack.c.bf16 %v772_v55, %v765_v54  ;;  %v1674_v62 = vpack.c.bf16 %v771_v59, %v764_v58  ;;  %v890_v55 = vld [vmem:[%s3392_s7 + $0x550] sm:$0xff]  ;;  %v912_v58 = vld [vmem:[%s3392_s7 + $0x600] sm:$0xff] }
 0x1e3   :  { %1659 = vmatpush1.bf16.msra.mxu1 %v1658_v2  ;;  %v793_v2 = vld [vmem:[%s3392_s7 + $0x248] sm:$0xff] }
 0x1e4   :  { %1661 = vmatprep.subr.bf16.mxu1 %v1660_v10  ;;  %v1680_v5 = vpack.c.bf16 %v800_v3, %v793_v2  ;;  %v1682_v10 = vpack.c.bf16 %v799_v7, %v792_v6  ;;  %v918_v3 = vld [vmem:[%s3392_s7 + $0x630] sm:$0xff]  ;;  %v940_v6 = vld [vmem:[%s3392_s7 + $0x6e0] sm:$0xff] }
 0x279   :  { %v1330_v27 = vpop.f32.mrb[0].mxu1 }
 0x27a   :  { %v1331_v29 = vpop.f32.mrb[1].mxu1 }
 0x27b   :  { %v1332_v30 = vadd.f32 %v1331_v29, %v1330_v27 }
 0x27d   :  { %v646_v33 = vadd.f32 %v1332_v30, %v1297_v28 }
 0x27f   :  { %650 = vst.msk [vmem:[%s3395_s10] sm:$0xff] %vm649_vm1, %v646_v33  ;;  %654 = vperm.xlu0 %1832, %v646_v33  }
 0x283   :  { %1833 = vset.pattern.permute.xlu0 %v1874_v53  ;;  %v757_v53 = vld [vmem:[%s3392_s7 + $0x128] sm:$0xff] }
 0x284   :  { %679 = vperm.xlu0 %1833, %v646_v33   ;;  %v1670_v56 = vpack.c.bf16 %v757_v53, %v750_v52  ;;  %v898_v52 = vld [vmem:[%s3392_s7 + $0x590] sm:$0xff] }
 0x2fe   :  { %v655_v18 = vpop.permute.xlu0 %654 }
 0x2ff   :  { %v676_v27 = vmul.f32 %v671_v19, %v655_v18  ;;  %v677_v28 = vmul.f32 %v675_v20, %v655_v18  ;;  %v1686_v18 = vpack.c.bf16 %v813_v15, %v806_v14  ;;  %v1688_v19 = vpack.c.bf16 %v828_v17, %v821_v16  ;;  %v820_v20 = vld [vmem:[%s3392_s7 + $0x320] sm:$0xff] }
 0x300   :  { %v732_v14 = vld [vmem:[%s3392_s7 + $0x60] sm:$0xff] }
 0x301   :  { %v724_v17 = vld [vmem:[%s3392_s7 + $0x20] sm:$0xff] }
 0x303   :  { %v680_v26 = vpop.permute.xlu0 %679 }
 0x304   :  { %v700_v29 = vmul.f32 %v695_v21, %v680_v26  ;;  %v701_v30 = vmul.f32 %v699_v22, %v680_v26  ;;  %v827_v21 = vld [vmem:[%s3392_s7 + $0x358] sm:$0xff]  ;;  %v834_v26 = vld [vmem:[%s3392_s7 + $0x390] sm:$0xff] }
 0x305   :  { %v835_v22 = vld [vmem:[%s3392_s7 + $0x398] sm:$0xff] }
 0x306   :  { %v702_v33 = vadd.f32 %v700_v29, %v676_v27  ;;  %v703_v35 = vadd.f32 %v701_v30, %v677_v28  ;;  %v841_v27 = vld [vmem:[%s3392_s7 + $0x3c8] sm:$0xff]  ;;  %v856_v29 = vld [vmem:[%s3392_s7 + $0x440] sm:$0xff] }
 0x307   :  { %v849_v28 = vld [vmem:[%s3392_s7 + $0x408] sm:$0xff]  ;;  %v1694_v30 = vpack.c.bf16 %v841_v27, %v834_v26  ;;  %v760_v26 = vld [vmem:[%s3392_s7 + $0x140] sm:$0xff] }
 0x308   :  { %v716_v38 = vadd.f32 %v709_v24, %v702_v33  ;;  %v717_v39 = vadd.f32 %v713_v25, %v703_v35  ;;  %v1690_v24 = vpack.c.bf16 %v827_v21, %v820_v20  ;;  %v1692_v25 = vpack.c.bf16 %v842_v23, %v835_v22  ;;  %v848_v35 = vld [vmem:[%s3392_s7 + $0x400] sm:$0xff]  ;;  %v746_v20 = vld [vmem:[%s3392_s7 + $0xd0] sm:$0xff] }
 0x309   :  { %v1696_v33 = vpack.c.bf16 %v856_v29, %v849_v28  ;;  %v738_v23 = vld [vmem:[%s3392_s7 + $0x90] sm:$0xff]  ;;  %v752_v29 = vld [vmem:[%s3392_s7 + $0x100] sm:$0xff] }
 0x30a   :  { %v2982_v42 = vmax.f32 %v716_v38, 0.0  ;;  %v2984_v43 = vmax.f32 %v717_v39, 0.0  ;;  %v870_v38 = vld [vmem:[%s3392_s7 + $0x4b0] sm:$0xff]  ;;  %v1698_v39 = vpack.c.bf16 %v855_v36, %v848_v35 }
 0x30b   :  { %v1700_v40 = vpack.c.bf16 %v870_v38, %v863_v37  ;;  %v774_v35 = vld [vmem:[%s3392_s7 + $0x1b0] sm:$0xff]  ;;  %v773_v38 = vld [vmem:[%s3392_s7 + $0x1a8] sm:$0xff] }
 0x30c   :  { %1045 = vmatprep.mubr.f32.mxu1 %v2984_v43  ;;  %1258 = vmatprep.mubr.f32.mxu0 %v2984_v43  ;;  %v766_v37 = vld [vmem:[%s3392_s7 + $0x170] sm:$0xff] }
 0x30d   :  { %1046 = vmatmul.mubr.f32.vlgmr.msra.gmra.mrb[2].mxu1 %v2982_v42  ;;  %1259 = vmatmul.mubr.f32.vlgmr.msra.gmra.mrb[2].mxu0 %v2982_v42 }
 0x30e   :  { %1663 = vmatpush1.bf16.msra.mxu1 %v1662_v44  ;;  %1116 = vmatprep.mubr.f32.mxu1 %v2984_v43  ;;  %v869_v44 = vld [vmem:[%s3392_s7 + $0x4a8] sm:$0xff] }
 0x30f   :  { %1665 = vmatprep.subr.bf16.mxu1 %v1664_v45  ;;  %v877_v45 = vld [vmem:[%s3392_s7 + $0x4e8] sm:$0xff]  ;;  %v1702_v47 = vpack.c.bf16 %v869_v44, %v862_v41  ;;  %v1738_v41 = vpack.c.bf16 %v773_v38, %v766_v37 }
 0x310   :  { %v1704_v48 = vpack.c.bf16 %v884_v46, %v877_v45  ;;  %v780_v45 = vld [vmem:[%s3392_s7 + $0x1e0] sm:$0xff]  ;;  %v787_v46 = vld [vmem:[%s3392_s7 + $0x218] sm:$0xff] }
 0x312   :  { %1667 = vmatpush1.bf16.msra.mxu1 %v1666_v50  ;;  %v883_v50 = vld [vmem:[%s3392_s7 + $0x518] sm:$0xff] }
 0x313   :  { %1669 = vmatprep.subr.bf16.mxu1 %v1668_v51  ;;  %v891_v51 = vld [vmem:[%s3392_s7 + $0x558] sm:$0xff]  ;;  %v1706_v53 = vpack.c.bf16 %v883_v50, %v876_v49  ;;  %v1742_v49 = vpack.c.bf16 %v787_v46, %v780_v45 }
 0x314   :  { %v1708_v54 = vpack.c.bf16 %v898_v52, %v891_v51  ;;  %v794_v51 = vld [vmem:[%s3392_s7 + $0x250] sm:$0xff]  ;;  %v801_v52 = vld [vmem:[%s3392_s7 + $0x288] sm:$0xff] }
 0x316   :  { %1671 = vmatpush1.bf16.msra.mxu1 %v1670_v56  ;;  %v897_v56 = vld [vmem:[%s3392_s7 + $0x588] sm:$0xff] }
 0x317   :  { %1673 = vmatprep.subr.bf16.mxu1 %v1672_v57  ;;  %v905_v57 = vld [vmem:[%s3392_s7 + $0x5c8] sm:$0xff]  ;;  %v1710_v59 = vpack.c.bf16 %v897_v56, %v890_v55  ;;  %v1746_v55 = vpack.c.bf16 %v801_v52, %v794_v51 }
 0x318   :  { %v1712_v60 = vpack.c.bf16 %v912_v58, %v905_v57  ;;  %v808_v57 = vld [vmem:[%s3392_s7 + $0x2c0] sm:$0xff]  ;;  %v815_v58 = vld [vmem:[%s3392_s7 + $0x2f8] sm:$0xff] }
 0x31a   :  { %1675 = vmatpush1.bf16.msra.mxu1 %v1674_v62  ;;  %v911_v62 = vld [vmem:[%s3392_s7 + $0x5f8] sm:$0xff] }
 0x31b   :  { %1677 = vmatprep.subr.bf16.mxu1 %v1676_v63  ;;  %v919_v63 = vld [vmem:[%s3392_s7 + $0x638] sm:$0xff]  ;;  %v1714_v1 = vpack.c.bf16 %v911_v62, %v904_v61  ;;  %v1750_v61 = vpack.c.bf16 %v815_v58, %v808_v57  ;;  %v972_v57 = vsub.s32 6, %v2637_v31 }
 0x31c   :  { %v1716_v2 = vpack.c.bf16 %v926_v0, %v919_v63  ;;  %v822_v63 = vld [vmem:[%s3392_s7 + $0x330] sm:$0xff]  ;;  %v829_v0 = vld [vmem:[%s3392_s7 + $0x368] sm:$0xff] }
 0x31e   :  { %1679 = vmatpush1.bf16.msra.mxu1 %v1678_v4  ;;  %v925_v4 = vld [vmem:[%s3392_s7 + $0x668] sm:$0xff] }
 0x31f   :  { %1681 = vmatprep.subr.bf16.mxu1 %v1680_v5  ;;  %v933_v5 = vld [vmem:[%s3392_s7 + $0x6a8] sm:$0xff]  ;;  %v1718_v7 = vpack.c.bf16 %v925_v4, %v918_v3  ;;  %v1754_v3 = vpack.c.bf16 %v829_v0, %v822_v63 }
 0x320   :  { %v1720_v8 = vpack.c.bf16 %v940_v6, %v933_v5  ;;  %v836_v5 = vld [vmem:[%s3392_s7 + $0x3a0] sm:$0xff]  ;;  %v843_v6 = vld [vmem:[%s3392_s7 + $0x3d8] sm:$0xff] }
 0x322   :  { %1683 = vmatpush1.bf16.msra.mxu1 %v1682_v10  ;;  %v939_v10 = vld [vmem:[%s3392_s7 + $0x6d8] sm:$0xff] }
 0x323   :  { %1685 = vmatprep.subr.bf16.mxu1 %v1684_v13  ;;  %v725_v13 = vld [vmem:[%s3392_s7 + $0x28] sm:$0xff]  ;;  %v1722_v15 = vpack.c.bf16 %v939_v10, %v932_v9  ;;  %v1758_v9 = vpack.c.bf16 %v843_v6, %v836_v5 }
 0x324   :  { %v1724_v16 = vpack.c.bf16 %v732_v14, %v725_v13  ;;  %v850_v13 = vld [vmem:[%s3392_s7 + $0x410] sm:$0xff]  ;;  %v857_v14 = vld [vmem:[%s3392_s7 + $0x448] sm:$0xff] }
 0x326   :  { %1687 = vmatpush1.bf16.msra.mxu1 %v1686_v18  ;;  %v731_v18 = vld [vmem:[%s3392_s7 + $0x58] sm:$0xff] }
 0x327   :  { %1689 = vmatprep.subr.bf16.mxu1 %v1688_v19  ;;  %v739_v19 = vld [vmem:[%s3392_s7 + $0x98] sm:$0xff]  ;;  %v1726_v21 = vpack.c.bf16 %v731_v18, %v724_v17  ;;  %v1762_v17 = vpack.c.bf16 %v857_v14, %v850_v13 }
 0x328   :  { %v1728_v22 = vpack.c.bf16 %v746_v20, %v739_v19  ;;  %v864_v19 = vld [vmem:[%s3392_s7 + $0x480] sm:$0xff]  ;;  %v871_v20 = vld [vmem:[%s3392_s7 + $0x4b8] sm:$0xff] }
 0x32a   :  { %1691 = vmatpush1.bf16.msra.mxu1 %v1690_v24  ;;  %v745_v24 = vld [vmem:[%s3392_s7 + $0xc8] sm:$0xff] }
 0x32b   :  { %1693 = vmatprep.subr.bf16.mxu1 %v1692_v25  ;;  %v753_v25 = vld [vmem:[%s3392_s7 + $0x108] sm:$0xff]  ;;  %v1730_v27 = vpack.c.bf16 %v745_v24, %v738_v23  ;;  %v1766_v23 = vpack.c.bf16 %v871_v20, %v864_v19 }
 0x32c   :  { %v1732_v28 = vpack.c.bf16 %v760_v26, %v753_v25  ;;  %v878_v25 = vld [vmem:[%s3392_s7 + $0x4f0] sm:$0xff]  ;;  %v885_v26 = vld [vmem:[%s3392_s7 + $0x528] sm:$0xff] }
 0x32e   :  { %1695 = vmatpush1.bf16.msra.mxu1 %v1694_v30  ;;  %v759_v30 = vld [vmem:[%s3392_s7 + $0x138] sm:$0xff] }
 0x32f   :  { %1697 = vmatprep.subr.bf16.mxu1 %v1696_v33  ;;  %v767_v33 = vld [vmem:[%s3392_s7 + $0x178] sm:$0xff] }
 0x330   :  { %v1736_v36 = vpack.c.bf16 %v774_v35, %v767_v33  ;;  %v892_v33 = vld [vmem:[%s3392_s7 + $0x560] sm:$0xff]  ;;  %v899_v35 = vld [vmem:[%s3392_s7 + $0x598] sm:$0xff] }
 0x331   :  { %v1774_v37 = vpack.c.bf16 %v899_v35, %v892_v33 }
 0x332   :  { %1699 = vmatpush1.bf16.msra.mxu1 %v1698_v39  ;;  %v781_v39 = vld [vmem:[%s3392_s7 + $0x1e8] sm:$0xff] }
 0x333   :  { %1701 = vmatprep.subr.bf16.mxu1 %v1700_v40  ;;  %v788_v40 = vld [vmem:[%s3392_s7 + $0x220] sm:$0xff] }
 0x334   :  { %v1740_v44 = vpack.c.bf16 %v788_v40, %v781_v39  ;;  %v906_v39 = vld [vmem:[%s3392_s7 + $0x5d0] sm:$0xff]  ;;  %v913_v40 = vld [vmem:[%s3392_s7 + $0x608] sm:$0xff] }
 0x335   :  { %v1778_v45 = vpack.c.bf16 %v913_v40, %v906_v39 }
 0x336   :  { %1703 = vmatpush1.bf16.msra.mxu1 %v1702_v47  ;;  %v795_v47 = vld [vmem:[%s3392_s7 + $0x258] sm:$0xff] }
 0x337   :  { %1705 = vmatprep.subr.bf16.mxu1 %v1704_v48  ;;  %v802_v48 = vld [vmem:[%s3392_s7 + $0x290] sm:$0xff] }
 0x338   :  { %v1744_v50 = vpack.c.bf16 %v802_v48, %v795_v47  ;;  %v920_v47 = vld [vmem:[%s3392_s7 + $0x640] sm:$0xff]  ;;  %v927_v48 = vld [vmem:[%s3392_s7 + $0x678] sm:$0xff] }
 0x339   :  { %v1782_v51 = vpack.c.bf16 %v927_v48, %v920_v47 }
 0x33a   :  { %1707 = vmatpush1.bf16.msra.mxu1 %v1706_v53  ;;  %v809_v53 = vld [vmem:[%s3392_s7 + $0x2c8] sm:$0xff] }
 0x33b   :  { %1709 = vmatprep.subr.bf16.mxu1 %v1708_v54  ;;  %v816_v54 = vld [vmem:[%s3392_s7 + $0x300] sm:$0xff] }
 0x33c   :  { %v1748_v56 = vpack.c.bf16 %v816_v54, %v809_v53  ;;  %v934_v53 = vld [vmem:[%s3392_s7 + $0x6b0] sm:$0xff]  ;;  %v941_v54 = vld [vmem:[%s3392_s7 + $0x6e8] sm:$0xff] }
 0x33e   :  { %1711 = vmatpush1.bf16.msra.mxu1 %v1710_v59  ;;  %v823_v59 = vld [vmem:[%s3392_s7 + $0x338] sm:$0xff] }
 0x33f   :  { %1713 = vmatprep.subr.bf16.mxu1 %v1712_v60  ;;  %v830_v60 = vld [vmem:[%s3392_s7 + $0x370] sm:$0xff] }
 0x340   :  { %v1752_v62 = vpack.c.bf16 %v830_v60, %v823_v59 }
 0x342   :  { %1715 = vmatpush1.bf16.msra.mxu1 %v1714_v1  ;;  %v837_v1 = vld [vmem:[%s3392_s7 + $0x3a8] sm:$0xff] }
 0x343   :  { %1717 = vmatprep.subr.bf16.mxu1 %v1716_v2  ;;  %v844_v2 = vld [vmem:[%s3392_s7 + $0x3e0] sm:$0xff] }
 0x344   :  { %v1756_v4 = vpack.c.bf16 %v844_v2, %v837_v1 }
 0x346   :  { %1719 = vmatpush1.bf16.msra.mxu1 %v1718_v7  ;;  %v851_v7 = vld [vmem:[%s3392_s7 + $0x418] sm:$0xff] }
 0x347   :  { %1721 = vmatprep.subr.bf16.mxu1 %v1720_v8  ;;  %v858_v8 = vld [vmem:[%s3392_s7 + $0x450] sm:$0xff] }
 0x348   :  { %v1760_v10 = vpack.c.bf16 %v858_v8, %v851_v7 }
 0x34a   :  { %1723 = vmatpush1.bf16.msra.mxu1 %v1722_v15  ;;  %v865_v15 = vld [vmem:[%s3392_s7 + $0x488] sm:$0xff] }
 0x34b   :  { %1725 = vmatprep.subr.bf16.mxu1 %v1724_v16  ;;  %v872_v16 = vld [vmem:[%s3392_s7 + $0x4c0] sm:$0xff] }
 0x34c   :  { %v1764_v18 = vpack.c.bf16 %v872_v16, %v865_v15  ;;  %v964_v15 = vsub.s32 4, %v2637_v31  ;;  %v968_v16 = vsub.s32 5, %v2637_v31 }
 0x34d   :  { %1117 = vmatmul.mubr.f32.vlgmr.msra.gmra.mrb[4].mxu1 %v2982_v42 }
 0x34e   :  { %1727 = vmatpush1.bf16.msra.mxu1 %v1726_v21  ;;  %1187 = vmatprep.mubr.f32.mxu1 %v2984_v43  ;;  %v1734_v43 = vpack.c.bf16 %v759_v30, %v752_v29  ;;  %v879_v21 = vld [vmem:[%s3392_s7 + $0x4f8] sm:$0xff]  ;;  %v1770_v29 = vpack.c.bf16 %v885_v26, %v878_v25 }
 0x34f   :  { %1729 = vmatprep.subr.bf16.mxu1 %v1728_v22  ;;  %v886_v22 = vld [vmem:[%s3392_s7 + $0x530] sm:$0xff] }
 0x350   :  { %v1768_v24 = vpack.c.bf16 %v886_v22, %v879_v21 }
 0x352   :  { %1731 = vmatpush1.bf16.msra.mxu1 %v1730_v27  ;;  %v893_v27 = vld [vmem:[%s3392_s7 + $0x568] sm:$0xff] }
 0x353   :  { %1733 = vmatprep.subr.bf16.mxu1 %v1732_v28  ;;  %v900_v28 = vld [vmem:[%s3392_s7 + $0x5a0] sm:$0xff] }
 0x354   :  { %v1772_v30 = vpack.c.bf16 %v900_v28, %v893_v27 }
 0x356   :  { %1735 = vmatpush1.bf16.msra.mxu1 %v1734_v43  ;;  %v907_v43 = vld [vmem:[%s3392_s7 + $0x5d8] sm:$0xff] }
 0x357   :  { %1737 = vmatprep.subr.bf16.mxu1 %v1736_v36  ;;  %v914_v36 = vld [vmem:[%s3392_s7 + $0x610] sm:$0xff] }
 0x358   :  { %v1776_v38 = vpack.c.bf16 %v914_v36, %v907_v43 }
 0x35a   :  { %1739 = vmatpush1.bf16.msra.mxu1 %v1738_v41  ;;  %v921_v41 = vld [vmem:[%s3392_s7 + $0x648] sm:$0xff] }
 0x35b   :  { %1741 = vmatprep.subr.bf16.mxu1 %v1740_v44  ;;  %v928_v44 = vld [vmem:[%s3392_s7 + $0x680] sm:$0xff] }
 0x35c   :  { %v1780_v46 = vpack.c.bf16 %v928_v44, %v921_v41 }
 0x35e   :  { %1743 = vmatpush1.bf16.msra.mxu1 %v1742_v49  ;;  %v935_v49 = vld [vmem:[%s3392_s7 + $0x6b8] sm:$0xff] }
 0x35f   :  { %1745 = vmatprep.subr.bf16.mxu1 %v1744_v50  ;;  %v942_v50 = vld [vmem:[%s3392_s7 + $0x6f0] sm:$0xff]  ;;  %s1875_s7 = smov [#allocation2]  }
 0x360   :  { %v1784_v52 = vpack.c.bf16 %v942_v50, %v935_v49 }
 0x362   :  { %1747 = vmatpush1.bf16.msra.mxu1 %v1746_v55  ;;  %v1786_v55 = vpack.c.bf16 %v941_v54, %v934_v53 }
 0x363   :  { %1749 = vmatprep.subr.bf16.mxu1 %v1748_v56  ;;  %v944_v56 = vld [vmem:[%s3393_s8] sm:$0x7f]  ;;  %s1284_s8 = sshll.u32 %s1875_s7, 4  ;;  %s1285_s8 = int_to_ptr.vmem [resolvable:$true] %s1284_s8 }
 0x364   :  { %v949_v58 = vrot.slane %v944_v56, %v2640_v32  ;;  %v953_v59 = vrot.slane %v944_v56, %v2646_v34  ;;  %v957_v32 = vrot.slane %v944_v56, %v664_v11  ;;  %v961_v34 = vrot.slane %v944_v56, %v688_v12  ;;  %s1848_s30 = scalar_lea.vmem %s1285_s8, 896  ;;  %p1853_p1 = scmp.lt.s32.totalorder %s1285_s8, %s1285_s8 }
 0x365   :  { %p1849_p0 = scmp.ne.s32.totalorder %s1285_s8, %s1848_s30  ;;  %p1854_p2 = scmp.lt.s32.totalorder %s1848_s30, %s1848_s30 }
 0x366   :  { %1751 = vmatpush1.bf16.msra.mxu1 %v1750_v61 }
 0x367   :  { %1753 = vmatprep.subr.bf16.mxu1 %v1752_v62  ;;  %v973_v62 = vrot.slane %v944_v56, %v972_v57  ;;  %p1855_p3 = por %p1854_p2, %p1853_p1 }
 0x369   :  { %p1856_p4 = pnand %p1855_p3, %p1849_p0 }
 0x36a   :  { %1755 = vmatpush1.bf16.msra.mxu1 %v1754_v3 }
 0x36b   :  { %1757 = vmatprep.subr.bf16.mxu1 %v1756_v4 }
 0x36e   :  { %1759 = vmatpush1.bf16.msra.mxu1 %v1758_v9 }
 0x36f   :  { %1761 = vmatprep.subr.bf16.mxu1 %v1760_v10 }
 0x372   :  { %1763 = vmatpush1.bf16.msra.mxu1 %v1762_v17  ;;  %v965_v17 = vrot.slane %v944_v56, %v964_v15 }
 0x373   :  { %1765 = vmatprep.subr.bf16.mxu1 %v1764_v18  ;;  %v969_v18 = vrot.slane %v944_v56, %v968_v16 }
 0x376   :  { %1767 = vmatpush1.bf16.msra.mxu1 %v1766_v23 }
 0x377   :  { %1769 = vmatprep.subr.bf16.mxu1 %v1768_v24 }
 0x37a   :  { %1771 = vmatpush1.bf16.msra.mxu1 %v1770_v29 }
 0x37b   :  { %1773 = vmatprep.subr.bf16.mxu1 %v1772_v30 }
 0x37e   :  { %1775 = vmatpush1.bf16.msra.mxu1 %v1774_v37 }
 0x37f   :  { %1777 = vmatprep.subr.bf16.mxu1 %v1776_v38 }
 0x382   :  { %1779 = vmatpush1.bf16.msra.mxu1 %v1778_v45 }
 0x383   :  { %1781 = vmatprep.subr.bf16.mxu1 %v1780_v46 }
 0x386   :  { %1783 = vmatpush1.bf16.msra.mxu1 %v1782_v51 }
 0x387   :  { %1785 = vmatprep.subr.bf16.mxu1 %v1784_v52 }
 0x38a   :  { %1787 = vmatpush1.bf16.msra.mxu1 %v1786_v55 }
 0x38d   :  { %1188 = vmatmul.mubr.f32.vlgmr.msra.gmra.mrb[6].mxu1 %v2982_v42 }
 0x3e0   :  { %v1047_v60 = vpop.f32.mrb[2].mxu1  ;;  %v1365_v61 = vpop.f32.mrb[2].mxu0 }
 0x3e1   :  { %v1048_v63 = vadd.f32 %v1047_v60, %v949_v58  ;;  %v1049_v0 = vpop.f32.mrb[3].mxu1  ;;  %v1366_v1 = vpop.f32.mrb[3].mxu0 }
 0x3e2   :  { %v1050_v2 = vadd.f32 %v1049_v0, %v953_v59  ;;  %v1367_v3 = vadd.f32 %v1366_v1, %v1365_v61 }
 0x3e3   :  { %1834 = vtanh.f32 %v1048_v63 }
 0x3e4   :  { %1836 = vtanh.f32 %v1050_v2  ;;  %v1261_v42 = vadd.f32 %v1367_v3, %v973_v62 }
 0x3e6   :  { %1838 = vtanh.f32 %v1261_v42 }
 0x3ed   :  { %v1835_v4 = vpop.eup %1834 }
 0x3ee   :  { %v1837_v5 = vpop.eup %1836  ;;  %1271 = vst [vmem:[#allocation2] sm:$0xff] %v1835_v4 }
 0x3ef   :  { %1272 = vst [vmem:[#allocation2 + $0x8] sm:$0xff] %v1837_v5 }
 0x3f0   :  { %v1839_v6 = vpop.eup %1838 }
 0x3f1   :  { %1277 = vst.msk [vmem:[#allocation2 + $0x30] sm:$0xff] %vm250_vm0, %v1839_v6 }
 0x420   :  { %v1118_v7 = vpop.f32.mrb[4].mxu1 }
 0x421   :  { %v1119_v8 = vadd.f32 %v1118_v7, %v957_v32  ;;  %v1120_v9 = vpop.f32.mrb[5].mxu1 }
 0x422   :  { %v1121_v10 = vadd.f32 %v1120_v9, %v961_v34 }
 0x423   :  { %1840 = vtanh.f32 %v1119_v8 }
 0x424   :  { %1842 = vtanh.f32 %v1121_v10 }
 0x42d   :  { %v1841_v13 = vpop.eup %1840 }
 0x42e   :  { %v1843_v14 = vpop.eup %1842  ;;  %1273 = vst [vmem:[#allocation2 + $0x10] sm:$0xff] %v1841_v13 }
 0x42f   :  { %1274 = vst [vmem:[#allocation2 + $0x18] sm:$0xff] %v1843_v14 }
 0x460   :  { %v1189_v11 = vpop.f32.mrb[6].mxu1 }
 0x461   :  { %v1190_v19 = vadd.f32 %v1189_v11, %v965_v17  ;;  %v1191_v20 = vpop.f32.mrb[7].mxu1 }
 0x462   :  { %v1192_v12 = vadd.f32 %v1191_v20, %v969_v18 }
 0x463   :  { %1844 = vtanh.f32 %v1190_v19 }
 0x464   :  { %1846 = vtanh.f32 %v1192_v12 }
 0x46d   :  { %v1845_v21 = vpop.eup %1844 }
 0x46e   :  { %v1847_v22 = vpop.eup %1846  ;;  %1275 = vst [vmem:[#allocation2 + $0x20] sm:$0xff] %v1845_v21 }
 0x46f   :  { %1276 = vst [vmem:[#allocation2 + $0x28] sm:$0xff] %v1847_v22 }
 0x470   :  { %1859 = shalt.err (!%p1856_p4)
}
 0x471   :  { %s1860_s11 = scalar_lea.hbm %s3394_s9, 896 }
 0x472   :  { %p1861_p5 = scmp.ne.s32.totalorder %s3394_s9, %s1860_s11  ;;  %p1864_p6 = scmp.lt.u32.totalorder %s1860_s11, %s3394_s9 }
 0x474   :  { %p1866_p7 = pnand %p1864_p6, %p1861_p5 }
 0x476   :  { %1869 = shalt.err (!%p1866_p7)
}
 0x477   :  { %1287 = dma.vmem_to_hbm [thread:$0]  %s1285_s8, 896, %s3394_s9, [#allocation3]  }
 0x478   :  { %1870 = dma.done.wait [#allocation3], 896  }
 0x479   :  { %1871 = vsyncadd [#allocation3], 4294966400 }
 0x47a   :  { %1295 = vsyncpa [#allocation3], 1 }

</bundles_post_ra>
